<compile_context>
chip_gen: v7x
topology: tpu7x:2x2x1
jax: 0.10.0
libtpu: 0.0.40
codegen_flags: <defaults>
</compile_context>

<pallas_src>
import functools

import jax
import jax.numpy as jnp
from jax.experimental import pallas as pl
from jax.experimental.pallas import tpu as pltpu


# ----------------------------------------------------------------------------
# Glue: patch extraction (convert_to_patches) and layout helpers (plain JAX)
# ----------------------------------------------------------------------------
def convert_to_patches(x, patch_size, masks, overlapping):
    """x: [B, D, T], masks: [B, 1, T] (float, 1.0 = valid).
    Returns patches [B, D, NP, P] and mask patches [B, 1, NP, P],
    with P = patch_size (non-overlapping) or 2*patch_size (overlapping)."""
    B, D, T = x.shape
    pad = (-T) % patch_size
    x = jnp.pad(x, ((0, 0), (0, 0), (0, pad)))
    masks = jnp.pad(masks, ((0, 0), (0, 0), (0, pad)))
    Tp = T + pad
    NP = Tp // patch_size
    if overlapping:
        half = patch_size // 2
        xp = jnp.pad(x, ((0, 0), (0, 0), (half, half)))
        mp = jnp.pad(masks, ((0, 0), (0, 0), (half, half)))
        idx = jnp.arange(NP)[:, None] * patch_size + jnp.arange(2 * patch_size)[None, :]
        patches = xp[:, :, idx]          # [B, D, NP, 2P]
        mask_patches = mp[:, :, idx]     # [B, 1, NP, 2P]
    else:
        patches = x.reshape(B, D, NP, patch_size)
        mask_patches = masks.reshape(B, 1, NP, patch_size)
    return patches, mask_patches


def _to_time_major(patches):
    """[B, D, NP, P] -> [B*NP, P, D]"""
    B, D, NP, P = patches.shape
    return patches.transpose(0, 2, 3, 1).reshape(B * NP, P, D)


def _vmem_capacity_bytes():
    """Physical per-core VMEM, with a conservative fallback."""
    try:
        info_fn = getattr(pltpu, "get_tpu_info", None)
        if info_fn is not None:
            return int(info_fn().vmem_capacity_bytes)
    except Exception:
        pass
    return 64 * 2 ** 20   # v7x-sized fallback (smallest of v5e/v6e/v7x)


def _choose_block_patches(bp, max_tb, per_patch_bytes, vmem_block_budget):
    """Pick TB (patches per grid step):
       * fits the (double-buffered) block VMEM budget,
       * divisor-aware: <= ~12.5% padded-patch waste,
       * keeps >= 2 grid steps when possible (v7x has 2 TensorCores)."""
    tb = max(1, min(bp, max_tb, vmem_block_budget // max(per_patch_bytes, 1)))
    for t in range(tb, 0, -1):
        waste = (-(-bp // t)) * t - bp
        if waste <= bp // 8:
            tb = t
            break
    if bp > 1 and -(-bp // tb) < 2:
        tb = -(-bp // 2)
    return int(tb)


# ----------------------------------------------------------------------------
# Pallas kernel: TB patches per grid step
#   bf16 fused projections + masked multi-head attention + GELU/out-proj
# ----------------------------------------------------------------------------
def _windowed_attn_kernel(*refs, num_heads, shared_kv):
    if shared_kv:
        (qp_ref, kp_ref, m_ref, wq_ref, bq_ref, wkv_ref, bkv_ref,
         wo_ref, bo_ref, out_ref, o_scr) = refs
    else:
        (qp_ref, kp_ref, vp_ref, m_ref, wq_ref, bq_ref, wkv_ref, bkv_ref,
         wo_ref, bo_ref, out_ref, o_scr) = refs

    f32 = jnp.float32
    bf16 = jnp.bfloat16
    TB, W, D = qp_ref.shape
    W2 = kp_ref.shape[1]
    dk = wq_ref.shape[1]
    dh = dk // num_heads

    dn_s = (((2,), (2,)), ((0,), (0,)))   # bqd,bkd -> bqk  (batched over TB)
    dn_pv = (((2,), (1,)), ((0,), (0,)))  # bqk,bkd -> bqd  (batched over TB)

    # ---- 1x1-conv projections: bf16 MXU operands, f32 accumulation ----------
    qp = qp_ref[...].reshape(TB * W, D)          # bf16
    kp = kp_ref[...].reshape(TB * W2, D)         # bf16
    q = jnp.dot(qp, wq_ref[...], preferred_element_type=f32) + bq_ref[...]
    if shared_kv:
        # fused K+V projection: one matmul (N = 2*dk) over the shared patches
        kv = jnp.dot(kp, wkv_ref[...], preferred_element_type=f32) + bkv_ref[...]
        k, v = kv[:, :dk], kv[:, dk:]
    else:
        vp = vp_ref[...].reshape(TB * W2, D)
        wkv = wkv_ref[...]
        bkv = bkv_ref[...]
        k = jnp.dot(kp, wkv[:, :dk], preferred_element_type=f32) + bkv[:, :dk]
        v = jnp.dot(vp, wkv[:, dk:], preferred_element_type=f32) + bkv[:, dk:]

    q3 = q.reshape(TB, W, dk).astype(bf16)
    k3 = k.reshape(TB, W2, dk).astype(bf16)
    v3 = v.reshape(TB, W2, dk).astype(bf16)

    # additive key-mask bias, computed ONCE per block (f32, broadcast over rows)
    bias = jnp.where(m_ref[...] > 0.0, jnp.float32(0.0), jnp.float32(-1e30))  # (TB,1,W2)
    scale = dh ** -0.5

    for h in range(num_heads):            # tiny static unroll; dots batched over TB
        lo, hi = h * dh, (h + 1) * dh
        qh = q3[:, :, lo:hi]               # (TB, W,  dh) bf16
        kh = k3[:, :, lo:hi]               # (TB, W2, dh) bf16
        vh = v3[:, :, lo:hi]               # (TB, W2, dh) bf16
        s = jax.lax.dot_general(qh, kh, dn_s, preferred_element_type=f32)
        s = s * scale + bias               # (TB, W, W2) f32
        s = s - jnp.max(s, axis=-1, keepdims=True)
        p = jnp.exp(s)
        p = p * pl.reciprocal(jnp.sum(p, axis=-1, keepdims=True), approx=True)
        # per-head PV (dh columns only) -> write this head's column slice
        pv = jax.lax.dot_general(p.astype(bf16), vh, dn_pv,
                                 preferred_element_type=f32)   # (TB, W, dh) f32
        o_scr[:, :, lo:hi] = pv

    # ---- out_proj: exact (erf) GELU in f32, then 1x1 conv dk -> D (bf16 MXU) -
    o = o_scr[...].reshape(TB * W, dk)
    g = 0.5 * o * (1.0 + jax.lax.erf(o * 0.7071067811865476))
    y = jnp.dot(g.astype(bf16), wo_ref[...], preferred_element_type=f32) + bo_ref[...]
    out_ref[...] = y.reshape(TB, W, D).astype(out_ref.dtype)


# ----------------------------------------------------------------------------
# Wrapper: full WindowedAttention forward
# ----------------------------------------------------------------------------
def windowed_attention(params, qk, v=None, masks=None, *, window, num_heads,
                       patches_per_block=128):
    B, D, T = qk.shape
    orig_dtype = qk.dtype
    bf16 = jnp.bfloat16
    if masks is None:
        masks = jnp.ones((B, 1, T), dtype=jnp.float32)
    masks = masks.astype(jnp.float32)
    qk32 = qk.astype(jnp.float32)

    # q: non-overlapping patches; k (and v): overlapping patches (window 2W, step W)
    q_pat, _ = convert_to_patches(qk32, window, masks, overlapping=False)
    k_pat, k_mask = convert_to_patches(qk32, window, masks, overlapping=True)
    shared_kv = v is None

    NP = q_pat.shape[2]
    BP = B * NP
    W2 = 2 * window
    qp = _to_time_major(q_pat).astype(bf16)                      # [BP, W,  D]
    kp = _to_time_major(k_pat).astype(bf16)                      # [BP, 2W, D]
    mk = k_mask.transpose(0, 2, 1, 3).reshape(BP, 1, W2).astype(jnp.float32)

    dk = params["wq"].shape[0]
    assert dk % num_heads == 0, "dim_key must be divisible by num_heads"

    # --- block size: VMEM-aware, divisor-aware, >= 2 grid steps ---------------
    itemsize_out = jnp.dtype(orig_dtype).itemsize
    act_bytes = (window * D + W2 * D + (0 if shared_kv else W2 * D)) * 2 + W2 * 4
    inter_bytes = (W2 * 2 * dk + 3 * window * dk + window * W2) * 4
    per_patch_bytes = 2 * act_bytes + 2 * window * D * itemsize_out + inter_bytes
    weight_bytes = 2 * 2 * (D * dk + D * 2 * dk + dk * D)        # double-buffered bf16
    vmem_cap = _vmem_capacity_bytes()
    vmem_limit = int(min((vmem_cap * 3) // 4, 96 * 2 ** 20))
    block_budget = max(per_patch_bytes, vmem_limit // 2 - weight_bytes)
    TB = _choose_block_patches(BP, patches_per_block, per_patch_bytes, block_budget)

    BPp = -(-BP // TB) * TB
    pad_bp = lambda x: jnp.pad(x, ((0, BPp - BP),) + ((0, 0),) * (x.ndim - 1))
    qp, kp, mk = pad_bp(qp), pad_bp(kp), pad_bp(mk)

    # weights: fuse K/V, pre-transpose so the contraction (model_dim) is leading,
    # cast to bf16 for the MXU; biases stay f32.
    wq_t = params["wq"].T.astype(bf16)                                         # [D, dk]
    wkv_t = jnp.concatenate([params["wk"], params["wv"]], 0).T.astype(bf16)    # [D, 2dk]
    wo_t = params["wo"].T.astype(bf16)                                         # [dk, D]
    bq = params["bq"].astype(jnp.float32)
    bkv = jnp.concatenate([params["bk"], params["bv"]], -1).astype(jnp.float32)
    bo = params["bo"].astype(jnp.float32)

    kernel = functools.partial(_windowed_attn_kernel, num_heads=num_heads,
                               shared_kv=shared_kv)

    act_specs = [
        pl.BlockSpec((TB, window, D), lambda i: (i, 0, 0)),      # q patches (bf16)
        pl.BlockSpec((TB, W2, D), lambda i: (i, 0, 0)),          # k patches (bf16)
    ]
    args = [qp, kp]
    if not shared_kv:
        vp = pad_bp(_to_time_major(
            convert_to_patches(v.astype(jnp.float32), window, masks, True)[0]
        ).astype(bf16))
        act_specs.append(pl.BlockSpec((TB, W2, D), lambda i: (i, 0, 0)))  # v patches
        args.append(vp)
    act_specs.append(pl.BlockSpec((TB, 1, W2), lambda i: (i, 0, 0)))      # key mask
    args.append(mk)

    # weights/biases: constant across the grid (index_map -> block 0)
    w_specs = [
        pl.BlockSpec((D, dk), lambda i: (0, 0)),                 # wq  (transposed)
        pl.BlockSpec((1, dk), lambda i: (0, 0)),                 # bq
        pl.BlockSpec((D, 2 * dk), lambda i: (0, 0)),             # wkv (fused, transposed)
        pl.BlockSpec((1, 2 * dk), lambda i: (0, 0)),             # bkv (fused)
        pl.BlockSpec((dk, D), lambda i: (0, 0)),                 # wo  (transposed)
        pl.BlockSpec((1, D), lambda i: (0, 0)),                  # bo
    ]
    w_args = [wq_t, bq, wkv_t, bkv, wo_t, bo]

    out_pat = pl.pallas_call(
        kernel,
        out_shape=jax.ShapeDtypeStruct((BPp, window, D), orig_dtype),
        grid=(BPp // TB,),
        in_specs=act_specs + w_specs,
        out_specs=pl.BlockSpec((TB, window, D), lambda i: (i, 0, 0)),
        scratch_shapes=[pltpu.VMEM((TB, window, dk), jnp.float32)],  # head-output assembly
        compiler_params=pltpu.CompilerParams(
            dimension_semantics=("parallel",),
            vmem_limit_bytes=vmem_limit),
    )(*args, *w_args)

    # undo reshape: (b num_patches) W D -> b D (num_patches W) ; crop to T; mask
    out = out_pat[:BP].reshape(B, NP, window, D).transpose(0, 3, 1, 2)
    out = out.reshape(B, D, NP * window)[:, :, :T]
    out = out * masks.astype(out.dtype)
    return out


# ----------------------------------------------------------------------------
# Deterministic parameter init (shapes from the module: dim_key=dim_value=D//2)
# ----------------------------------------------------------------------------
def init_params(key, model_dim):
    dk = model_dim // 2
    keys = jax.random.split(key, 8)

    def wt(k, shape):
        return (jax.random.normal(k, shape, jnp.float32) / jnp.sqrt(shape[-1])).astype(jnp.float32)

    def bias(k, n):
        return 0.01 * jax.random.normal(k, (1, n), jnp.float32)

    return dict(
        wq=wt(keys[0], (dk, model_dim)), bq=bias(keys[1], dk),
        wk=wt(keys[2], (dk, model_dim)), bk=bias(keys[3], dk),
        wv=wt(keys[4], (dk, model_dim)), bv=bias(keys[5], dk),
        wo=wt(keys[6], (model_dim, dk)), bo=bias(keys[7], model_dim),
    )


# ----------------------------------------------------------------------------
# Pure-JAX f32 reference (same math, vectorized) for a sanity check
# ----------------------------------------------------------------------------
def reference_forward(params, qk, v=None, masks=None, *, window, num_heads):
    B, D, T = qk.shape
    if masks is None:
        masks = jnp.ones((B, 1, T), dtype=qk.dtype)
    masks = masks.astype(qk.dtype)
    q_pat, _ = convert_to_patches(qk, window, masks, False)
    k_pat, k_mask = convert_to_patches(qk, window, masks, True)
    v_pat = convert_to_patches(v, window, masks, True)[0] if v is not None else k_pat
    NP = q_pat.shape[2]
    BP = B * NP
    qp, kp, vp = _to_time_major(q_pat), _to_time_major(k_pat), _to_time_major(v_pat)
    mk = k_mask.transpose(0, 2, 1, 3).reshape(BP, 1, 2 * window)

    q = jnp.einsum('btd,ed->bte', qp, params['wq']) + params['bq']
    k = jnp.einsum('btd,ed->bte', kp, params['wk']) + params['bk']
    vv = jnp.einsum('btd,ed->bte', vp, params['wv']) + params['bv']
    dk = q.shape[-1]
    dh = dk // num_heads
    qh = q.reshape(BP, window, num_heads, dh)
    kh = k.reshape(BP, 2 * window, num_heads, dh)
    vh = vv.reshape(BP, 2 * window, num_heads, dh)
    s = jnp.einsum('bqhd,bkhd->bhqk', qh, kh) * (dh ** -0.5)
    keep = (mk > 0)[:, :, None, :]
    s = jnp.where(keep, s, -jnp.finfo(jnp.float32).max)
    a = jax.nn.softmax(s, axis=-1)
    o = jnp.einsum('bhqk,bkhd->bqhd', a, vh).reshape(BP, window, dk)
    g = 0.5 * o * (1.0 + jax.lax.erf(o * 0.7071067811865476))
    y = jnp.einsum('bte,de->btd', g, params['wo']) + params['bo']
    out = y.reshape(B, NP, window, D).transpose(0, 3, 1, 2).reshape(B, D, NP * window)[:, :, :T]
    return out * masks


def _check(name, out, ref):
    err = jnp.abs(out.astype(jnp.float32) - ref.astype(jnp.float32))
    max_err = float(jnp.max(err))
    mean_err = float(jnp.mean(err))
    # mixed-precision (bf16 MXU operands) vs pure-f32 reference
    assert max_err < 1e-1 and mean_err < 2e-2, (
        f"{name}: max abs err {max_err:.4f}, mean abs err {mean_err:.4f}")


if __name__ == "__main__":
    key = jax.random.PRNGKey(0)
    k_params, k_x, k_v = jax.random.split(key, 3)

    B, D, T = 2, 32, 45          # batch, model_dim, seq_len (not a multiple of window)
    window = 8                   # windowed_attn_w
    num_heads = 2                # attn_params.num_attn_heads

    params = init_params(k_params, D)
    qk = jax.random.normal(k_x, (B, D, T), jnp.float32)
    masks = jnp.ones((B, 1, T), jnp.float32)
    masks = masks.at[1, :, T - 7:].set(0.0)   # second sequence has a padded tail

    # default path: v is None (k/v projections fused into one matmul)
    out = windowed_attention(params, qk, v=None, masks=masks,
                             window=window, num_heads=num_heads)
    out = jax.block_until_ready(out)
    assert out.shape == (B, D, T)
    ref = reference_forward(params, qk, v=None, masks=masks,
                            window=window, num_heads=num_heads)
    _check("shared_kv", out, ref)

    # explicit-v path
    v_in = 0.5 * jax.random.normal(k_v, (B, D, T), jnp.float32)
    out_v = windowed_attention(params, qk, v=v_in, masks=masks,
                               window=window, num_heads=num_heads)
    out_v = jax.block_until_ready(out_v)
    ref_v = reference_forward(params, qk, v=v_in, masks=masks,
                              window=window, num_heads=num_heads)
    _check("explicit_v", out_v, ref_v)

    print("KERNEL_OK")
</pallas_src>

<mosaic_0001>
module attributes {stable_mosaic.version = 11 : i64} {
  func.func @_windowed_attn_kernel(%arg0: i32, %arg1: memref<6x8x32xbf16, #tpu.memory_space<vmem>>, %arg2: memref<6x16x32xbf16, #tpu.memory_space<vmem>>, %arg3: memref<6x1x16xf32, #tpu.memory_space<vmem>>, %arg4: memref<32x16xbf16, #tpu.memory_space<vmem>>, %arg5: memref<1x16xf32, #tpu.memory_space<vmem>>, %arg6: memref<32x32xbf16, #tpu.memory_space<vmem>>, %arg7: memref<1x32xf32, #tpu.memory_space<vmem>>, %arg8: memref<16x32xbf16, #tpu.memory_space<vmem>>, %arg9: memref<1x32xf32, #tpu.memory_space<vmem>>, %arg10: memref<6x8x32xf32, #tpu.memory_space<vmem>>, %arg11: memref<6x8x16xf32, #tpu.memory_space<vmem>>) attributes {dimension_semantics = [#tpu.dimension_semantics<parallel>], iteration_bounds = array<i64: 2>, scalar_prefetch = 0 : i64, scratch_operands = 1 : i64, tpu.core_type = #tpu.core_type<tc>, window_params = [{transform_indices = @transform_0, window_bounds = array<i64: 6, 8, 32>}, {transform_indices = @transform_1, window_bounds = array<i64: 6, 16, 32>}, {transform_indices = @transform_2, window_bounds = array<i64: 6, 1, 16>}, {pipeline_mode = #tpu.pipeline_mode<synchronous>, transform_indices = @transform_3, window_bounds = array<i64: 32, 16>}, {pipeline_mode = #tpu.pipeline_mode<synchronous>, transform_indices = @transform_4, window_bounds = array<i64: 1, 16>}, {pipeline_mode = #tpu.pipeline_mode<synchronous>, transform_indices = @transform_5, window_bounds = array<i64: 32, 32>}, {pipeline_mode = #tpu.pipeline_mode<synchronous>, transform_indices = @transform_6, window_bounds = array<i64: 1, 32>}, {pipeline_mode = #tpu.pipeline_mode<synchronous>, transform_indices = @transform_7, window_bounds = array<i64: 16, 32>}, {pipeline_mode = #tpu.pipeline_mode<synchronous>, transform_indices = @transform_8, window_bounds = array<i64: 1, 32>}, {transform_indices = @transform_9, window_bounds = array<i64: 6, 8, 32>}]} {
    %c0 = arith.constant 0 : index
    %c0_0 = arith.constant 0 : index
    %c0_1 = arith.constant 0 : index
    %0 = vector.load %arg1[%c0, %c0_0, %c0_1] : memref<6x8x32xbf16, #tpu.memory_space<vmem>>, vector<6x8x32xbf16>
    %1 = vector.shape_cast %0 : vector<6x8x32xbf16> to vector<48x32xbf16>
    %c0_2 = arith.constant 0 : index
    %c0_3 = arith.constant 0 : index
    %c0_4 = arith.constant 0 : index
    %2 = vector.load %arg2[%c0_2, %c0_3, %c0_4] : memref<6x16x32xbf16, #tpu.memory_space<vmem>>, vector<6x16x32xbf16>
    %3 = vector.shape_cast %2 : vector<6x16x32xbf16> to vector<96x32xbf16>
    %c0_5 = arith.constant 0 : index
    %c0_6 = arith.constant 0 : index
    %4 = vector.load %arg4[%c0_5, %c0_6] : memref<32x16xbf16, #tpu.memory_space<vmem>>, vector<32x16xbf16>
    %cst = arith.constant dense<0.000000e+00> : vector<48x16xf32>
    %5 = tpu.matmul %1, %4, %cst {dimension_numbers = #tpu.dot_dimension_numbers<[1], [0], [0], [1], [0, 0, 1, 1], [], []>} : vector<48x32xbf16>, vector<32x16xbf16>, vector<48x16xf32> -> vector<48x16xf32>
    %c0_7 = arith.constant 0 : index
    %c0_8 = arith.constant 0 : index
    %6 = vector.load %arg5[%c0_7, %c0_8] : memref<1x16xf32, #tpu.memory_space<vmem>>, vector<1x16xf32>
    %7 = vector.broadcast %6 : vector<1x16xf32> to vector<48x16xf32>
    %8 = arith.addf %5, %7 : vector<48x16xf32>
    %c0_9 = arith.constant 0 : index
    %c0_10 = arith.constant 0 : index
    %9 = vector.load %arg6[%c0_9, %c0_10] : memref<32x32xbf16, #tpu.memory_space<vmem>>, vector<32x32xbf16>
    %cst_11 = arith.constant dense<0.000000e+00> : vector<96x32xf32>
    %10 = tpu.matmul %3, %9, %cst_11 {dimension_numbers = #tpu.dot_dimension_numbers<[1], [0], [0], [1], [0, 0, 1, 1], [], []>} : vector<96x32xbf16>, vector<32x32xbf16>, vector<96x32xf32> -> vector<96x32xf32>
    %c0_12 = arith.constant 0 : index
    %c0_13 = arith.constant 0 : index
    %11 = vector.load %arg7[%c0_12, %c0_13] : memref<1x32xf32, #tpu.memory_space<vmem>>, vector<1x32xf32>
    %12 = vector.broadcast %11 : vector<1x32xf32> to vector<96x32xf32>
    %13 = arith.addf %10, %12 : vector<96x32xf32>
    %14 = vector.extract_strided_slice %13 {offsets = [0, 0], sizes = [96, 16], strides = [1, 1]} : vector<96x32xf32> to vector<96x16xf32>
    %15 = vector.extract_strided_slice %13 {offsets = [0, 16], sizes = [96, 16], strides = [1, 1]} : vector<96x32xf32> to vector<96x16xf32>
    %16 = vector.shape_cast %8 : vector<48x16xf32> to vector<6x8x16xf32>
    %17 = arith.truncf %16 : vector<6x8x16xf32> to vector<6x8x16xbf16>
    %18 = vector.shape_cast %14 : vector<96x16xf32> to vector<6x16x16xf32>
    %19 = arith.truncf %18 : vector<6x16x16xf32> to vector<6x16x16xbf16>
    %20 = vector.shape_cast %15 : vector<96x16xf32> to vector<6x16x16xf32>
    %21 = arith.truncf %20 : vector<6x16x16xf32> to vector<6x16x16xbf16>
    %c0_14 = arith.constant 0 : index
    %c0_15 = arith.constant 0 : index
    %c0_16 = arith.constant 0 : index
    %22 = vector.load %arg3[%c0_14, %c0_15, %c0_16] : memref<6x1x16xf32, #tpu.memory_space<vmem>>, vector<6x1x16xf32>
    %cst_17 = arith.constant 0.000000e+00 : f32
    %23 = vector.broadcast %cst_17 : f32 to vector<6x1x16xf32>
    %24 = arith.cmpf ogt, %22, %23 : vector<6x1x16xf32>
    %cst_18 = arith.constant 0.000000e+00 : f32
    %cst_19 = arith.constant -1.000000e+30 : f32
    %25 = vector.broadcast %cst_18 : f32 to vector<6x1x16xf32>
    %26 = vector.broadcast %cst_19 : f32 to vector<6x1x16xf32>
    %27 = arith.select %24, %25, %26 : vector<6x1x16xi1>, vector<6x1x16xf32>
    %28 = vector.extract_strided_slice %17 {offsets = [0, 0, 0], sizes = [6, 8, 8], strides = [1, 1, 1]} : vector<6x8x16xbf16> to vector<6x8x8xbf16>
    %29 = vector.extract_strided_slice %19 {offsets = [0, 0, 0], sizes = [6, 16, 8], strides = [1, 1, 1]} : vector<6x16x16xbf16> to vector<6x16x8xbf16>
    %30 = vector.extract_strided_slice %21 {offsets = [0, 0, 0], sizes = [6, 16, 8], strides = [1, 1, 1]} : vector<6x16x16xbf16> to vector<6x16x8xbf16>
    %cst_20 = arith.constant dense<0.000000e+00> : vector<6x8x16xf32>
    %31 = tpu.matmul %28, %29, %cst_20 {dimension_numbers = #tpu.dot_dimension_numbers<[2], [2], [1], [1], [0, 0, 0, 1, 1, 1], [0], [0]>} : vector<6x8x8xbf16>, vector<6x16x8xbf16>, vector<6x8x16xf32> -> vector<6x8x16xf32>
    %cst_21 = arith.constant 0.353553385 : f32
    %32 = vector.broadcast %cst_21 : f32 to vector<6x8x16xf32>
    %33 = arith.mulf %31, %32 : vector<6x8x16xf32>
    %34 = vector.broadcast %27 : vector<6x1x16xf32> to vector<6x8x16xf32>
    %35 = arith.addf %33, %34 : vector<6x8x16xf32>
    %cst_22 = arith.constant dense<0xFF800000> : vector<6x8xf32>
    %36 = vector.multi_reduction <maximumf>, %35, %cst_22 [2] : vector<6x8x16xf32> to vector<6x8xf32>
    %37 = vector.shape_cast %36 : vector<6x8xf32> to vector<6x8x1xf32>
    %38 = vector.broadcast %37 : vector<6x8x1xf32> to vector<6x8x16xf32>
    %39 = arith.subf %35, %38 : vector<6x8x16xf32>
    %40 = math.exp %39 : vector<6x8x16xf32>
    %cst_23 = arith.constant dense<0.000000e+00> : vector<6x8xf32>
    %41 = vector.multi_reduction <add>, %40, %cst_23 [2] : vector<6x8x16xf32> to vector<6x8xf32>
    %42 = vector.shape_cast %41 : vector<6x8xf32> to vector<6x8x1xf32>
    %43 = tpu.reciprocal %42 {approx = true} : vector<6x8x1xf32> -> vector<6x8x1xf32>
    %44 = vector.broadcast %43 : vector<6x8x1xf32> to vector<6x8x16xf32>
    %45 = arith.mulf %40, %44 : vector<6x8x16xf32>
    %46 = arith.truncf %45 : vector<6x8x16xf32> to vector<6x8x16xbf16>
    %cst_24 = arith.constant dense<0.000000e+00> : vector<6x8x8xf32>
    %47 = tpu.matmul %46, %30, %cst_24 {dimension_numbers = #tpu.dot_dimension_numbers<[2], [1], [1], [2], [0, 0, 0, 1, 1, 2], [0], [0]>} : vector<6x8x16xbf16>, vector<6x16x8xbf16>, vector<6x8x8xf32> -> vector<6x8x8xf32>
    %c0_25 = arith.constant 0 : index
    %c0_26 = arith.constant 0 : index
    %c0_27 = arith.constant 0 : index
    %48 = vector.load %arg11[%c0_25, %c0_26, %c0_27] : memref<6x8x16xf32, #tpu.memory_space<vmem>>, vector<6x8x8xf32>
    tpu.vector_store %arg11[%c0_25, %c0_26, %c0_27], %47 {strides = array<i32>} : memref<6x8x16xf32, #tpu.memory_space<vmem>>, vector<6x8x8xf32>,
    %49 = vector.extract_strided_slice %17 {offsets = [0, 0, 8], sizes = [6, 8, 8], strides = [1, 1, 1]} : vector<6x8x16xbf16> to vector<6x8x8xbf16>
    %50 = vector.extract_strided_slice %19 {offsets = [0, 0, 8], sizes = [6, 16, 8], strides = [1, 1, 1]} : vector<6x16x16xbf16> to vector<6x16x8xbf16>
    %51 = vector.extract_strided_slice %21 {offsets = [0, 0, 8], sizes = [6, 16, 8], strides = [1, 1, 1]} : vector<6x16x16xbf16> to vector<6x16x8xbf16>
    %cst_28 = arith.constant dense<0.000000e+00> : vector<6x8x16xf32>
    %52 = tpu.matmul %49, %50, %cst_28 {dimension_numbers = #tpu.dot_dimension_numbers<[2], [2], [1], [1], [0, 0, 0, 1, 1, 1], [0], [0]>} : vector<6x8x8xbf16>, vector<6x16x8xbf16>, vector<6x8x16xf32> -> vector<6x8x16xf32>
    %cst_29 = arith.constant 0.353553385 : f32
    %53 = vector.broadcast %cst_29 : f32 to vector<6x8x16xf32>
    %54 = arith.mulf %52, %53 : vector<6x8x16xf32>
    %55 = vector.broadcast %27 : vector<6x1x16xf32> to vector<6x8x16xf32>
    %56 = arith.addf %54, %55 : vector<6x8x16xf32>
    %cst_30 = arith.constant dense<0xFF800000> : vector<6x8xf32>
    %57 = vector.multi_reduction <maximumf>, %56, %cst_30 [2] : vector<6x8x16xf32> to vector<6x8xf32>
    %58 = vector.shape_cast %57 : vector<6x8xf32> to vector<6x8x1xf32>
    %59 = vector.broadcast %58 : vector<6x8x1xf32> to vector<6x8x16xf32>
    %60 = arith.subf %56, %59 : vector<6x8x16xf32>
    %61 = math.exp %60 : vector<6x8x16xf32>
    %cst_31 = arith.constant dense<0.000000e+00> : vector<6x8xf32>
    %62 = vector.multi_reduction <add>, %61, %cst_31 [2] : vector<6x8x16xf32> to vector<6x8xf32>
    %63 = vector.shape_cast %62 : vector<6x8xf32> to vector<6x8x1xf32>
    %64 = tpu.reciprocal %63 {approx = true} : vector<6x8x1xf32> -> vector<6x8x1xf32>
    %65 = vector.broadcast %64 : vector<6x8x1xf32> to vector<6x8x16xf32>
    %66 = arith.mulf %61, %65 : vector<6x8x16xf32>
    %67 = arith.truncf %66 : vector<6x8x16xf32> to vector<6x8x16xbf16>
    %cst_32 = arith.constant dense<0.000000e+00> : vector<6x8x8xf32>
    %68 = tpu.matmul %67, %51, %cst_32 {dimension_numbers = #tpu.dot_dimension_numbers<[2], [1], [1], [2], [0, 0, 0, 1, 1, 2], [0], [0]>} : vector<6x8x16xbf16>, vector<6x16x8xbf16>, vector<6x8x8xf32> -> vector<6x8x8xf32>
    %c0_33 = arith.constant 0 : index
    %c0_34 = arith.constant 0 : index
    %c8 = arith.constant 8 : index
    %69 = vector.load %arg11[%c0_33, %c0_34, %c8] : memref<6x8x16xf32, #tpu.memory_space<vmem>>, vector<6x8x8xf32>
    tpu.vector_store %arg11[%c0_33, %c0_34, %c8], %68 {strides = array<i32>} : memref<6x8x16xf32, #tpu.memory_space<vmem>>, vector<6x8x8xf32>,
    %c0_35 = arith.constant 0 : index
    %c0_36 = arith.constant 0 : index
    %c0_37 = arith.constant 0 : index
    %70 = vector.load %arg11[%c0_35, %c0_36, %c0_37] : memref<6x8x16xf32, #tpu.memory_space<vmem>>, vector<6x8x16xf32>
    %71 = vector.shape_cast %70 : vector<6x8x16xf32> to vector<48x16xf32>
    %cst_38 = arith.constant 5.000000e-01 : f32
    %72 = vector.broadcast %cst_38 : f32 to vector<48x16xf32>
    %73 = arith.mulf %72, %71 : vector<48x16xf32>
    %cst_39 = arith.constant 0.707106769 : f32
    %74 = vector.broadcast %cst_39 : f32 to vector<48x16xf32>
    %75 = arith.mulf %71, %74 : vector<48x16xf32>
    %76 = math.erf %75 : vector<48x16xf32>
    %cst_40 = arith.constant 1.000000e+00 : f32
    %77 = vector.broadcast %cst_40 : f32 to vector<48x16xf32>
    %78 = arith.addf %77, %76 : vector<48x16xf32>
    %79 = arith.mulf %73, %78 : vector<48x16xf32>
    %80 = arith.truncf %79 : vector<48x16xf32> to vector<48x16xbf16>
    %c0_41 = arith.constant 0 : index
    %c0_42 = arith.constant 0 : index
    %81 = vector.load %arg8[%c0_41, %c0_42] : memref<16x32xbf16, #tpu.memory_space<vmem>>, vector<16x32xbf16>
    %cst_43 = arith.constant dense<0.000000e+00> : vector<48x32xf32>
    %82 = tpu.matmul %80, %81, %cst_43 {dimension_numbers = #tpu.dot_dimension_numbers<[1], [0], [0], [1], [0, 0, 1, 1], [], []>} : vector<48x16xbf16>, vector<16x32xbf16>, vector<48x32xf32> -> vector<48x32xf32>
    %c0_44 = arith.constant 0 : index
    %c0_45 = arith.constant 0 : index
    %83 = vector.load %arg9[%c0_44, %c0_45] : memref<1x32xf32, #tpu.memory_space<vmem>>, vector<1x32xf32>
    %84 = vector.broadcast %83 : vector<1x32xf32> to vector<48x32xf32>
    %85 = arith.addf %82, %84 : vector<48x32xf32>
    %86 = vector.shape_cast %85 : vector<48x32xf32> to vector<6x8x32xf32>
    %c0_46 = arith.constant 0 : index
    %c0_47 = arith.constant 0 : index
    %c0_48 = arith.constant 0 : index
    %87 = vector.load %arg10[%c0_46, %c0_47, %c0_48] : memref<6x8x32xf32, #tpu.memory_space<vmem>>, vector<6x8x32xf32>
    tpu.vector_store %arg10[%c0_46, %c0_47, %c0_48], %86 {strides = array<i32>} : memref<6x8x32xf32, #tpu.memory_space<vmem>>, vector<6x8x32xf32>,
    return
  }
  func.func @transform_0(%arg0: i32) -> (i32, i32, i32) {
    %c0_i32 = arith.constant 0 : i32
    %c0_i32_0 = arith.constant 0 : i32
    %c0_i32_1 = arith.constant 0 : i32
    return %arg0, %c0_i32, %c0_i32_0 : i32, i32, i32
  }
  func.func @transform_1(%arg0: i32) -> (i32, i32, i32) {
    %c0_i32 = arith.constant 0 : i32
    %c0_i32_0 = arith.constant 0 : i32
    %c0_i32_1 = arith.constant 0 : i32
    return %arg0, %c0_i32, %c0_i32_0 : i32, i32, i32
  }
  func.func @transform_2(%arg0: i32) -> (i32, i32, i32) {
    %c0_i32 = arith.constant 0 : i32
    %c0_i32_0 = arith.constant 0 : i32
    %c0_i32_1 = arith.constant 0 : i32
    return %arg0, %c0_i32, %c0_i32_0 : i32, i32, i32
  }
  func.func @transform_3(%arg0: i32) -> (i32, i32) {
    %c0_i32 = arith.constant 0 : i32
    %c0_i32_0 = arith.constant 0 : i32
    %c0_i32_1 = arith.constant 0 : i32
    return %c0_i32, %c0_i32_0 : i32, i32
  }
  func.func @transform_4(%arg0: i32) -> (i32, i32) {
    %c0_i32 = arith.constant 0 : i32
    %c0_i32_0 = arith.constant 0 : i32
    %c0_i32_1 = arith.constant 0 : i32
    return %c0_i32, %c0_i32_0 : i32, i32
  }
  func.func @transform_5(%arg0: i32) -> (i32, i32) {
    %c0_i32 = arith.constant 0 : i32
    %c0_i32_0 = arith.constant 0 : i32
    %c0_i32_1 = arith.constant 0 : i32
    return %c0_i32, %c0_i32_0 : i32, i32
  }
  func.func @transform_6(%arg0: i32) -> (i32, i32) {
    %c0_i32 = arith.constant 0 : i32
    %c0_i32_0 = arith.constant 0 : i32
    %c0_i32_1 = arith.constant 0 : i32
    return %c0_i32, %c0_i32_0 : i32, i32
  }
  func.func @transform_7(%arg0: i32) -> (i32, i32) {
    %c0_i32 = arith.constant 0 : i32
    %c0_i32_0 = arith.constant 0 : i32
    %c0_i32_1 = arith.constant 0 : i32
    return %c0_i32, %c0_i32_0 : i32, i32
  }
  func.func @transform_8(%arg0: i32) -> (i32, i32) {
    %c0_i32 = arith.constant 0 : i32
    %c0_i32_0 = arith.constant 0 : i32
    %c0_i32_1 = arith.constant 0 : i32
    return %c0_i32, %c0_i32_0 : i32, i32
  }
  func.func @transform_9(%arg0: i32) -> (i32, i32, i32) {
    %c0_i32 = arith.constant 0 : i32
    %c0_i32_0 = arith.constant 0 : i32
    %c0_i32_1 = arith.constant 0 : i32
    return %arg0, %c0_i32, %c0_i32_0 : i32, i32, i32
  }
}

</mosaic_0001>

<bundles_post_ra>
// kernel: tpu_custom_call.1
= control target key start
LH: loop header
LB: loop body
LE: loop exit
PB: predicated region body
PF: predicated region fallthrough
CT: control target
= control target key end

     0   :  { %s3570_s0 = inlined_call_operand.hbm [shape: bf16[12,8,32], index: 0, kind: input, shape index: {}]   ;;  %s3571_s1 = inlined_call_operand.hbm [shape: bf16[12,16,32], index: 1, kind: input, shape index: {}]   ;;  %s3572_s2 = inlined_call_operand.vmem [shape: f32[12,1,16], index: 2, kind: input, shape index: {}]   ;;  %s3573_s3 = inlined_call_operand.vmem [shape: bf16[32,16], index: 3, kind: input, shape index: {}]   ;;  %s3574_s4 = inlined_call_operand.vmem [shape: f32[1,16], index: 4, kind: input, shape index: {}]   ;;  %s3575_s5 = inlined_call_operand.vmem [shape: bf16[32,32], index: 5, kind: input, shape index: {}]   ;;  %s3576_s6 = inlined_call_operand.vmem [shape: f32[1,32], index: 6, kind: input, shape index: {}]   ;;  %s3577_s7 = inlined_call_operand.vmem [shape: bf16[16,32], index: 7, kind: input, shape index: {}]   ;;  %s3578_s8 = inlined_call_operand.vmem [shape: f32[1,32], index: 8, kind: input, shape index: {}]   ;;  %s3579_s9 = inlined_call_operand.hbm [shape: f32[12,8,32], index: 9, kind: output, shape index: {}]  }
   0x1   :  { %3586 = sst [smem:[#allocation15_spill]] %s3570_s0 }
   0x2   :  { %14 = vsyncpa [#allocation4], 0 }
   0x3   :  { %16 = vsyncpa [#allocation4 + $0x1], 0 }
   0x4   :  { %17 = vsyncpa [#allocation7], 0 }
   0x5   :  { %19 = vsyncpa [#allocation7 + $0x1], 0 }
   0x6   :  { %20 = vsyncpa [#allocation5], 0 }
   0x7   :  { %22 = vsyncpa [#allocation5 + $0x1], 0  ;;  %s3009_s30 = smov 0   ;;  %s3011_s10 = smov 0  }
   0x8   :  { %s3013_s11 = smov 0   ;;  %s3015_s12 = smov 0  }
   0x9 LB: > { %3587 = sst [smem:[#allocation12_spill]] %s2940_s11  ;;  %s3030_s13 = sadd.s32 4294967295, %s2944_s12   ;;  %s2944_s12 = sphi %s3015_s12, %s3601_s12   ;;  %s2940_s11 = sphi %s3013_s11, %s3603_s11   ;;  %s2936_s10 = sphi %s3011_s10, %s3605_s10   ;;  %s2932_s30 = sphi %s3009_s30, %s3604_s30  }
   0xa   : > { %s2348_s14 = sadd.s32 4294967294, %s2944_s12   ;;  %s3034_s15 = sadd.s32 1, %s2944_s12  }
   0xb   : > { %3588 = sst [smem:[#allocation13_spill]] %s3034_s15  ;;  %s35_s16 = sadd.s32 1, %s2940_s11 }
   0xc   : > { %s32_s17 = ssub.s32 %s2944_s12, %s3034_s15  ;;  %p42_p0 = scmp.ne.s32.totalorder %s2940_s11, %s2936_s10 }
   0xd   : > { %p33_p1 = scmp.eq.s32.totalorder %s32_s17, 0  ;;  %p43_p2 = scmp.eq.s32.totalorder %s2944_s12, 0 }
   0xe   : > { %p48_p3 = scmp.ne.s32.totalorder %s2936_s10, %s2932_s30  ;;  %p49_p4 = scmp.eq.s32.totalorder %s3030_s13, 0 }
   0xf   : > { %s3046_s18 = scalar_select %p33_p1, %s2940_s11, %s35_s16  }
  0x10   : > { %p44_p5 = por %p43_p2, %p42_p0  ;;  %p3048_p6 = por %p49_p4, %p48_p3 }
  0x11   : > { %3589 = sst [smem:[#allocation14_spill]] %s3046_s18  ;;  %p250_p7 = scmp.eq.s32.totalorder %s3030_s13, 1 }
  0x12   : > { %s3590_s19 = scalar_select %p3048_p6, 1, 0 }
  0x13   : > { %p256_p8 = scmp.eq.s32.totalorder %s2348_s14, 1  ;;  %p2696_p10 = scmp.lt.s32.totalorder %s2944_s12, 2 }
  0x14   : > { %p3055_p11 = por %p250_p7, %p42_p0  ;;  %s3064_s22 = sand.u32 1, %s2940_s11  }
  0x15   : > { %p3059_p12 = por %p256_p8, %p48_p3  ;;  %s2411_s23 = smul.u32 384, %s2944_s12 }
  0x16   : > { %s3591_s20 = scalar_select %p3055_p11, 1, 0 }
  0x17   : > { %s3592_s21 = scalar_select %p3059_p12, 1, 0 }
  0x18   : > { %s2675_s24 = smul.u32 24, %s3064_s22  ;;  %s3593_s0 = sld [smem:[#allocation15_spill]] }
  0x19   : > { %p3073_p13 = pnand %p2696_p10, %p44_p5  ;;  %s295_s16 = scalar_lea.sflag [#allocation4], %s3064_s22 }
  0x1a   : > { %s298_s29 = scalar_lea.vmem [#allocation3], %s2675_s24 }
  0x1b   : > { %s305_s14 = sshll.u32 %s298_s29, 4  ;;  %p2816_p1 = pneg %p3073_p13  ;;  %s3077_s14 = int_to_ptr.vmem [resolvable:$true] %s305_s14 }
  0x1e   : > { %s3071_s27 = scalar_lea.hbm %s3593_s0, %s2411_s23  ;;  %s2819_s26 = scalar_lea.hbm %s3593_s0, 768 }
  0x1f   : > { %s2814_s17 = scalar_lea.hbm %s3071_s27, 384  ;;  %p2820_p4 = scmp.lt.u32.totalorder %s3071_s27, %s3593_s0 }
  0x20   : > { %p2815_p0 = scmp.ne.s32.totalorder %s3071_s27, %s2814_s17  ;;  %p2821_p5 = scmp.lt.u32.totalorder %s2819_s26, %s2814_s17 }
  0x21   : > { %p2823_p8 = scmp.lt.u32.totalorder %s2814_s17, %s3071_s27 }
  0x22   : > { %p2817_p2 = pnand %p2816_p1, %p2815_p0  ;;  %p2822_p7 = por %p2821_p5, %p2820_p4 }
  0x24   : > { %p2818_p3 = pneg %p2817_p2  ;;  %p2824_p10 = por %p2823_p8, %p2822_p7 }
  0x26   : > { %p2825_p9 = pnand %p2824_p10, %p2818_p3 }
  0x28   : > { %2828 = shalt.err (!%p2825_p9)
}
  0x29   : > { %s2829_s24 = scalar_lea.vmem %s3077_s14, 384  ;;  %s2946_s29 = smov [#allocation3]  }
  0x2a   : > { %p2830_p0 = scmp.ne.s32.totalorder %s3077_s14, %s2829_s24  ;;  %s2834_s23 = sshll.u32 %s2946_s29, 4  ;;  %s2835_s23 = int_to_ptr.vmem [resolvable:$false] %s2834_s23 }
  0x2b   : > { %s2836_s11 = scalar_lea.vmem %s2835_s23, 768  ;;  %p2837_p11 = scmp.lt.s32.totalorder %s3077_s14, %s2835_s23 }
  0x2c   : > { %p2832_p2 = pnand %p2830_p0, %p2816_p1  ;;  %p2838_p4 = scmp.lt.s32.totalorder %s2836_s11, %s2829_s24 }
  0x2e   : > { %p2833_p12 = pneg %p2832_p2  ;;  %p2839_p5 = por %p2838_p4, %p2837_p11 }
  0x30   : > { %p2840_p7 = pnand %p2839_p5, %p2833_p12 }
  0x32   : > { %2843 = shalt.err (!%p2840_p7)
}
  0x33   : > { %s3584_s18 = smov 64   ;;  %s2948_s17 = smov 4  }
  0x34   : > { %2688 = dma.hbm_to_vmem [thread:$0]  (!%p3073_p13), %s3071_s27, 384, %s3077_s14, %s295_s16, %s3584_s18, %s3584_s18, %s2948_s17  }
  0x35   : > { %p2354_p9 = scmp.ge.s32.totalorder %s2944_s12, 1  ;;  %p343_p11 = scmp.lt.s32.totalorder %s2944_s12, 3 }
  0x36   : > { %s2676_s25 = smul.u32 48, %s3064_s22  ;;  %s316_s27 = scalar_lea.sflag [#allocation7], %s3064_s22 }
  0x37   : > { %p3113_p12 = pnand %p2354_p9, %p343_p11  ;;  %s2415_s24 = smul.u32 768, %s2944_s12 }
  0x38   : > { %s319_s0 = scalar_lea.vmem [#allocation6], %s2676_s25 }
  0x39   : > { %s3121_s11 = scalar_lea.hbm %s3571_s1, %s2415_s24  ;;  %s327_s15 = sshll.u32 %s319_s0, 4  ;;  %s3123_s15 = int_to_ptr.vmem [resolvable:$true] %s327_s15 }
  0x3a   : > { %s2844_s14 = scalar_lea.hbm %s3121_s11, 768  ;;  %s2849_s24 = scalar_lea.hbm %s3571_s1, 1536 }
  0x3b   : > { %p2845_p3 = scmp.ne.s32.totalorder %s3121_s11, %s2844_s14  ;;  %p2850_p0 = scmp.lt.u32.totalorder %s3121_s11, %s3571_s1 }
  0x3c   : > { %p2851_p2 = scmp.lt.u32.totalorder %s2849_s24, %s2844_s14  ;;  %p2853_p5 = scmp.lt.u32.totalorder %s2844_s14, %s3121_s11 }
  0x3d   : > { %p2847_p8 = pnand %p2845_p3, %p2816_p1 }
  0x3e   : > { %p2852_p4 = por %p2851_p2, %p2850_p0 }
  0x3f   : > { %p2848_p10 = pneg %p2847_p8 }
  0x40   : > { %p2854_p7 = por %p2853_p5, %p2852_p4 }
  0x42   : > { %p2855_p9 = pnand %p2854_p7, %p2848_p10 }
  0x44   : > { %2858 = shalt.err (!%p2855_p9)
}
  0x45   : > { %s2859_s0 = scalar_lea.vmem %s3123_s15, 768  ;;  %s2949_s18 = smov [#allocation6]  }
  0x46   : > { %p2860_p11 = scmp.ne.s32.totalorder %s3123_s15, %s2859_s0  ;;  %s2864_s25 = sshll.u32 %s2949_s18, 4  ;;  %s2865_s25 = int_to_ptr.vmem [resolvable:$false] %s2864_s25 }
  0x47   : > { %s2866_s16 = scalar_lea.vmem %s2865_s25, 1536  ;;  %p2867_p6 = scmp.lt.s32.totalorder %s3123_s15, %s2865_s25 }
  0x48   : > { %p2862_p3 = pnand %p2860_p11, %p2816_p1  ;;  %p2868_p0 = scmp.lt.s32.totalorder %s2866_s16, %s2859_s0 }
  0x4a   : > { %p2863_p8 = pneg %p2862_p3  ;;  %p2869_p2 = por %p2868_p0, %p2867_p6 }
  0x4c   : > { %p2870_p4 = pnand %p2869_p2, %p2863_p8 }
  0x4e   : > { %2873 = shalt.err (!%p2870_p4)
}
  0x4f   : > { %s3596_s14 = smov 64   ;;  %347 = sbr.rel (%p3113_p12) target bundleno = 2130 (0x852), region = 56 }
  0x50   : > { %2691 = dma.hbm_to_vmem [thread:$0]  (!%p3073_p13), %s3121_s11, 768, %s3123_s15, %s316_s27, %s3596_s14, %s3596_s14, %s2948_s17  }
  0x51   : > { %s3157_s24 = sand.u32 (!%p3113_p12), 1, %s2936_s10   ;;  %p3597_p6 = scmp.ne.s32.totalorder (!%p3113_p12), %s3590_s19, 0 }
  0x52   : > { %s2677_s29 = smul.u32 (!%p3113_p12), 24, %s3157_s24  ;;  %s350_s23 = scalar_lea.sflag (!%p3113_p12), [#allocation4], %s3157_s24 }
  0x54   : > { %s3161_s28 = scalar_lea.vmem (!%p3113_p12), [#allocation3], %s2677_s29 }
  0x56   : > { %2919 = dma.done.wait (%p3597_p6), %s350_s23, 384  }
  0x57   : > { %2921 = vsyncadd (%p3597_p6), %s350_s23, 4294966912  ;;  %s2678_s15 = smul.u32 48, %s3157_s24  ;;  %s359_s22 = scalar_lea.sflag [#allocation7], %s3157_s24 }
  0x59   : > { %s3171_s17 = scalar_lea.vmem [#allocation6], %s2678_s15 }
  0x5a   : > { %2923 = dma.done.wait (%p3597_p6), %s359_s22, 768  }
  0x5b   : > { %2925 = vsyncadd (%p3597_p6), %s359_s22, 4294966528  ;;  %v2950_v0 = vmov 0.0   ;;  %vm2951_vm0 = vmmov 0   ;;  %v2740_v1 = vld [vmem:[%s3573_s3] sm:$0xff]   ;;  %v2741_v2 = vld [vmem:[%s3573_s3 + $0x8] sm:$0xff]   ;;  %vm471_vm1 = vcmask 261120  }
  0x5c   : > { %2671 = vmatprep.subr.bf16.mxu1 %v2950_v0  ;;  %2489 = vmatprep.mubr.msk.bf16.mxu1 %vm2951_vm0, %v2950_v0  ;;  %v2744_v3 = vld [vmem:[%s3575_s5] sm:$0xff]   ;;  %v2742_v4 = vld [vmem:[%s3161_s28 + $0x8] sm:$0xff]   ;;  %v2745_v5 = vld [vmem:[%s3575_s5 + $0x8] sm:$0xff]   ;;  %vm720_vm2 = vcmask 64512   ;;  %s408_s22 = smul.u32 6, %s3030_s13  ;;  %vm1045_vm6 = vcmask 130048  }
  0x5d   : > { %2481 = vmatprep.subr.bf16.mxu0 %v2950_v0  ;;  %2485 = vmatprep.mubr.msk.bf16.mxu0 %vm2951_vm0, %v2950_v0  ;;  %v2749_v6 = vld [vmem:[%s3161_s28] sm:$0xff]   ;;  %v2743_v7 = vld [vmem:[%s3161_s28 + $0x10] sm:$0xff]   ;;  %s2953_s19 = smov 112   ;;  %s2954_s27 = smov 120   ;;  %vm2096_vm10 = vcmask 130112  }
  0x5e   : > { %2673 = vmatpush3.bf16.msra.mxu1 %v2740_v1  ;;  %2482 = vmatpush3.bf16.msra.mxu0 %v2740_v1  ;;  %v2746_v8 = vld [vmem:[%s3171_s17] sm:$0xff]   ;;  %v2747_v9 = vld [vmem:[%s3171_s17 + $0x8] sm:$0xff]   ;;  %v2748_v10 = vld [vmem:[%s3171_s17 + $0x10] sm:$0xff]   ;;  %p409_p13 = scmp.lt.s32.totalorder %s408_s22, 11  ;;  %s2955_s0 = smov 104  }
  0x5f   : > { %2672 = vmatprep.subr.bf16.mxu1 %v2950_v0  ;;  %2483 = vmatprep.subr.bf16.mxu0 %v2950_v0  ;;  %v2750_v11 = vld [vmem:[%s3171_s17 + $0x18] sm:$0xff]   ;;  %v2751_v12 = vld [vmem:[%s3171_s17 + $0x20] sm:$0xff]   ;;  %v2752_v13 = vld [vmem:[%s3171_s17 + $0x28] sm:$0xff]   ;;  %s2956_s16 = smov 8   ;;  %s405_s23 = scalar_lea.vmem [#allocation8], %s2678_s15 }
  0x60   : > { %v2364_v27 = vld [vmem:[%s3576_s6] ss:$0 sm:$0xff]  ;;  %s3607_s22 = smov (!%p409_p13, %s408_s22), 11  ;;  %s2243_s28 = sshll.u32 %s405_s23, 4  ;;  %s3518_s28 = int_to_ptr.vmem [resolvable:$true] %s2243_s28 }
  0x61   : > { %v2355_v38 = vld [vmem:[%s3574_s4] ss:$0 sm:$0xff]  ;;  %s3305_s11 = scalar_lea.vmem %s3572_s2, %s3607_s22  ;;  %s2414_s15 = smul.u32 768, %s3030_s13 }
  0x62   : > { %2674 = vmatpush3.bf16.msra.mxu1 %v2741_v2  ;;  %2484 = vmatpush3.bf16.msra.mxu0 %v2741_v2  ;;  %s2230_s13 = scalar_lea.sflag [#allocation5], %s3157_s24  ;;  %p3598_p12 = scmp.ne.s32.totalorder %s3591_s20, 0 }
  0x63   : > { %2497 = vmatprep.subr.bf16.mxu1 %v2744_v3  ;;  %2513 = vmatprep.subr.bf16.mxu0 %v2950_v0  ;;  %s3524_s26 = scalar_lea.hbm %s3579_s9, %s2414_s15 }
  0x65   : > { %2490 = vmatmul.mubr.msk.bf16.vlgmr.msra.gmra.mrb[0].mxu1 %vm471_vm1, %v2742_v4  ;;  %2486 = vmatmul.mubr.msk.bf16.vlgmr.msra.gmra.mrb[0].mxu0 %vm471_vm1, %v2749_v6 }
  0x66   : > { %2493 = vmatprep.mubr.msk.bf16.mxu1 %vm2951_vm0, %v2950_v0  ;;  %2498 = vmatpush3.bf16.msra.mxu1 %v2744_v3 }
  0x67   : > { %2499 = vmatprep.subr.bf16.mxu1 %v2745_v5  ;;  %2515 = vmatprep.mubr.msk.bf16.mxu0 %vm2951_vm0, %v2950_v0 }
  0x6a   : > { %2500 = vmatpush3.bf16.msra.mxu1 %v2745_v5 }
  0x6b   : > { %2519 = vmatprep.subr.bf16.mxu1 %v2950_v0 }
  0x6d   : > { %2494 = vmatmul.mubr.msk.bf16.gmra.mrb[4].mxu1 %vm471_vm1, %v2743_v7 }
  0x6e   : > { %2501 = vmatprep.mubr.msk.bf16.mxu1 %vm471_vm1, %v2746_v8 }
  0x75   : > { %2502 = vmatmul.mubr.msk.bf16.vlgmr.msra.gmra.mrb[8].mxu1 %vm471_vm1, %v2747_v9 }
  0x76   : > { %2505 = vmatprep.mubr.msk.bf16.mxu1 %vm471_vm1, %v2748_v10 }
  0x7d   : > { %2506 = vmatmul.mubr.msk.bf16.gmra.mrb[12].mxu1 %vm471_vm1, %v2750_v11 }
  0x7e   : > { %2509 = vmatprep.mubr.msk.bf16.mxu1 %vm471_vm1, %v2751_v12 }
  0x85   : > { %2510 = vmatmul.mubr.msk.bf16.gmra.mrb[16].mxu1 %vm471_vm1, %v2752_v13  ;;  %v1009_v13 = vlaneseq }
  0x86   : > { %2521 = vmatprep.mubr.msk.bf16.mxu1 %vm2951_vm0, %v2950_v0 }
 0x138   : > { %v523_v14 = vpop.f32.mrb[0].mxu1  ;;  %v515_v17 = vpop.f32.mrb[0].mxu0 }
 0x139   : > { %v2491_v15 = vpop.f32.mrb[1].mxu1  ;;  %v2487_v19 = vpop.f32.mrb[1].mxu0  ;;  %v516_v43 = vadd.f32 %v2355_v38, %v515_v17  ;;  %v524_v60 = vadd.f32 %v2355_v38, %v523_v14  ;;  %v703_v14 = vld [vmem:[%s3305_s11 + $0x1] sm:$0x1] }
 0x13a   : > { %v526_v16 = vpop.f32.mrb[2].mxu1  ;;  %v518_v20 = vpop.f32.mrb[2].mxu0  ;;  %v1010_v15 = vshrl.u32 %v1009_v13, 7  ;;  %vm709_vm3 = vcmp.gt.f32.partialorder %v703_v14, 0.0 }
 0x13b   : > { %v2492_v18 = vpop.f32.mrb[3].mxu1  ;;  %v2488_v21 = vpop.f32.mrb[3].mxu0  ;;  %v519_v42 = vadd.f32 %v2355_v38, %v518_v20  ;;  %v3247_v52 = vpack.c.bf16 %v516_v43, %v516_v43  ;;  %v527_v57 = vadd.f32 %v2355_v38, %v526_v16  ;;  %v3269_v5 = vpack.c.bf16 %v524_v60, %v524_v60  ;;  %v702_v16 = vld [vmem:[%s3305_s11] sm:$0x1] }
 0x13c   : > { %v1011_v17 = vsub.s32 0, %v1010_v15  ;;  %vm708_vm4 = vcmp.gt.f32.partialorder %v702_v16, 0.0  ;;  %v2952_v18 = vmov -1e+30   ;;  %v705_v21 = vld [vmem:[%s3305_s11 + $0x3] sm:$0x1] }
 0x13d   : > { %v3243_v50 = vpack.c.bf16 %v519_v42, %v519_v42  ;;  %v3265_v3 = vpack.c.bf16 %v527_v57, %v527_v57  ;;  %v715_v19 = vsel %vm709_vm3, 0.0, %v2952_v18  ;;  %v714_v20 = vsel %vm708_vm4, 0.0, %v2952_v18  ;;  %v707_v42 = vld [vmem:[%s3305_s11 + $0x5] sm:$0x1] }
 0x13e   : > { %vm711_vm5 = vcmp.gt.f32.partialorder %v705_v21, 0.0  ;;  %vm713_vm8 = vcmp.gt.f32.partialorder %v707_v42, 0.0 }
 0x140   : > { %v3223_v22 = vpop.f32.mrb[4].mxu1 }
 0x141   : > { %v2495_v23 = vpop.f32.mrb[5].mxu1  ;;  %v532_v10 = vadd.f32 %v2355_v38, %v3223_v22  ;;  %v3310_v22 = vrot.slane %v715_v19, %v1011_v17 }
 0x142   : > { %v3225_v24 = vpop.f32.mrb[6].mxu1 }
 0x143   : > { %v2496_v25 = vpop.f32.mrb[7].mxu1  ;;  %v535_v9 = vadd.f32 %v2355_v38, %v3225_v24  ;;  %v3291_v12 = vpack.c.bf16 %v532_v10, %v532_v10  ;;  %v704_v24 = vld [vmem:[%s3305_s11 + $0x2] sm:$0x1]  ;;  %v717_v38 = vsel %vm711_vm5, 0.0, %v2952_v18 }
 0x144   : > { %vm710_vm7 = vcmp.gt.f32.partialorder %v704_v24, 0.0  ;;  %v3319_v43 = vrot.slane %v717_v38, %v1011_v17 }
 0x145   : > { %v3289_v11 = vpack.c.bf16 %v535_v9, %v535_v9 }
 0x148   : > { %v2503_v26 = vpop.f32.mrb[8].mxu1 }
 0x149   : > { %v643_v28 = vpop.f32.mrb[9].mxu1  ;;  %v652_v30 = vadd.f32 %v2503_v26, %v2364_v27 }
 0x14a   : > { %v2504_v29 = vpop.f32.mrb[10].mxu1  ;;  %v644_v33 = vadd.f32 %v2364_v27, %v643_v28  ;;  %v3313_v28 = vrot.slane %v714_v20, %v1011_v17 }
 0x14b   : > { %v655_v31 = vadd.f32 %v2504_v29, %v2364_v27  ;;  %v646_v32 = vpop.f32.mrb[11].mxu1 }
 0x14c   : > { %v647_v34 = vadd.f32 %v2364_v27, %v646_v32 }
 0x14d   : > { %v3230_v35 = vpack.c.bf16 %v655_v31, %v652_v30 }
 0x14e   : > { %v3232_v36 = vpack.c.bf16 %v647_v34, %v644_v33 }
 0x14f   : > { %v771_v37 = vsel %vm720_vm2, %v3230_v35, 0 }
 0x150   : > { %v2507_v39 = vpop.f32.mrb[12].mxu1  ;;  %2520 = vmatpush3.bf16.xpose.msra.mxu1 %v771_v37  ;;  %v725_v40 = vsel %vm720_vm2, %v3232_v36, 0 }
 0x151   : > { %v659_v41 = vpop.f32.mrb[13].mxu1  ;;  %2514 = vmatpush3.bf16.xpose.msra.mxu0 %v725_v40  ;;  %2531 = vmatprep.subr.bf16.mxu1 %v2950_v0  ;;  %v668_v45 = vadd.f32 %v2507_v39, %v2364_v27 }
 0x152   : > { %v2508_v44 = vpop.f32.mrb[14].mxu1  ;;  %2525 = vmatprep.subr.bf16.mxu0 %v2950_v0  ;;  %v660_v48 = vadd.f32 %v2364_v27, %v659_v41  ;;  %v716_v41 = vsel %vm710_vm7, 0.0, %v2952_v18 }
 0x153   : > { %v671_v46 = vadd.f32 %v2508_v44, %v2364_v27  ;;  %v662_v47 = vpop.f32.mrb[15].mxu1  ;;  %v706_v44 = vld [vmem:[%s3305_s11 + $0x4] sm:$0x1]  ;;  %s2874_s11 = scalar_lea.vmem %s3518_s28, 768 }
 0x154   : > { %v663_v49 = vadd.f32 %v2364_v27, %v662_v47  ;;  %vm712_vm9 = vcmp.gt.f32.partialorder %v706_v44, 0.0  ;;  %p2875_p1 = scmp.ne.s32.totalorder %s3518_s28, %s2874_s11 }
 0x155   : > { %v3245_v51 = vpack.c.bf16 %v671_v46, %v668_v45 }
 0x156   : > { %v3249_v53 = vpack.c.bf16 %v663_v49, %v660_v48  ;;  %p2876_p10 = pnand %p2875_p1, %p3598_p12 }
 0x157   : > { %2522 = vmatmul.mubr.msk.bf16.vlgmr.msra.gmra.mrb[20].mxu1 %vm720_vm2, %v3243_v50  ;;  %v863_v54 = vsel %vm720_vm2, %v3245_v51, 0 }
 0x158   : > { %v2511_v55 = vpop.f32.mrb[16].mxu1  ;;  %2516 = vmatmul.mubr.msk.bf16.vlgmr.msra.gmra.mrb[4].mxu0 %vm720_vm2, %v3247_v52  ;;  %2532 = vmatpush3.bf16.xpose.msra.mxu1 %v863_v54  ;;  %v817_v56 = vsel %vm720_vm2, %v3249_v53, 0  ;;  %v3323_v54 = vrot.slane %v716_v41, %v1011_v17  ;;  %p2877_p5 = pneg %p2876_p10 }
 0x159   : > { %v684_v58 = vadd.f32 %v2511_v55, %v2364_v27  ;;  %v675_v59 = vpop.f32.mrb[17].mxu1  ;;  %2526 = vmatpush3.bf16.xpose.msra.mxu0 %v817_v56  ;;  %2533 = vmatprep.mubr.msk.bf16.mxu1 %vm2951_vm0, %v2950_v0 }
 0x15a   : > { %v676_v61 = vadd.f32 %v2364_v27, %v675_v59  ;;  %v2512_v62 = vpop.f32.mrb[18].mxu1  ;;  %2527 = vmatprep.mubr.msk.bf16.mxu0 %vm2951_vm0, %v2950_v0  ;;  %2543 = vmatprep.subr.bf16.mxu1 %v2950_v0 }
 0x15b   : > { %v687_v63 = vadd.f32 %v2512_v62, %v2364_v27  ;;  %v678_v1 = vpop.f32.mrb[19].mxu1  ;;  %2537 = vmatprep.subr.bf16.mxu0 %v2950_v0  ;;  %v719_v62 = vsel %vm713_vm8, 0.0, %v2952_v18 }
 0x15c   : > { %v679_v2 = vadd.f32 %v2364_v27, %v678_v1 }
 0x15d   : > { %v3267_v4 = vpack.c.bf16 %v687_v63, %v684_v58 }
 0x15e   : > { %v3271_v6 = vpack.c.bf16 %v679_v2, %v676_v61  ;;  %v718_v2 = vsel %vm712_vm9, 0.0, %v2952_v18 }
 0x15f   : > { %2534 = vmatmul.mubr.msk.bf16.vlgmr.msra.gmra.mrb[24].mxu1 %vm720_vm2, %v3265_v3  ;;  %v955_v7 = vsel %vm720_vm2, %v3267_v4, 0  ;;  %v3330_v9 = vrot.slane %v718_v2, %v1011_v17 }
 0x160   : > { %2528 = vmatmul.mubr.msk.bf16.vlgmr.msra.gmra.mrb[8].mxu0 %vm720_vm2, %v3269_v5  ;;  %2544 = vmatpush3.bf16.xpose.msra.mxu1 %v955_v7  ;;  %v909_v8 = vsel %vm720_vm2, %v3271_v6, 0  ;;  %v3328_v7 = vrot.slane %v719_v62, %v1011_v17 }
 0x161   : > { %2538 = vmatpush3.bf16.xpose.msra.mxu0 %v909_v8  ;;  %2545 = vmatprep.mubr.msk.bf16.mxu1 %vm2951_vm0, %v2950_v0 }
 0x162   : > { %2539 = vmatprep.mubr.msk.bf16.mxu0 %vm2951_vm0, %v2950_v0  ;;  %2555 = vmatprep.subr.bf16.mxu1 %v2950_v0 }
 0x163   : > { %2549 = vmatprep.subr.bf16.mxu0 %v2950_v0 }
 0x167   : > { %2546 = vmatmul.mubr.msk.bf16.vlgmr.msra.gmra.mrb[28].mxu1 %vm720_vm2, %v3289_v11 }
 0x168   : > { %2540 = vmatmul.mubr.msk.bf16.vlgmr.msra.gmra.mrb[12].mxu0 %vm720_vm2, %v3291_v12  ;;  %2557 = vmatprep.mubr.msk.bf16.mxu1 %vm2951_vm0, %v2950_v0 }
 0x169   : > { %2551 = vmatprep.mubr.msk.bf16.mxu0 %vm2951_vm0, %v2950_v0 }
 0x22a   : > { %v807_v23 = vpop.f32.mrb[20].mxu1 }
 0x22b   : > { %v998_v25 = vmul.f32 0.35355338, %v807_v23  ;;  %v761_v26 = vpop.f32.mrb[4].mxu0  ;;  %v2523_v27 = vpop.f32.mrb[21].mxu1 }
 0x22c   : > { %v997_v29 = vmul.f32 0.35355338, %v761_v26  ;;  %v2517_v30 = vpop.f32.mrb[5].mxu0  ;;  %v810_v31 = vpop.f32.mrb[22].mxu1 }
 0x22d   : > { %v1040_v32 = vadd.f32 %v3310_v22, %v998_v25  ;;  %v764_v33 = vpop.f32.mrb[6].mxu0  ;;  %v2524_v34 = vpop.f32.mrb[23].mxu1 }
 0x22e   : > { %v2518_v37 = vpop.f32.mrb[7].mxu0  ;;  %v1039_v40 = vadd.f32 %v3313_v28, %v997_v29 }
 0x22f   : > { %v1049_v39 = vsel %vm1045_vm6, %v1040_v32, -inf }
 0x230   : > { %1050 = vmax.xlane.f32.xlu0 %v1049_v39  ;;  %v1046_v49 = vsel %vm1045_vm6, %v1039_v40, -inf }
 0x232   : > { %v899_v45 = vpop.f32.mrb[24].mxu1 }
 0x233   : > { %v1000_v46 = vmul.f32 0.35355338, %v899_v45  ;;  %v853_v47 = vpop.f32.mrb[8].mxu0  ;;  %v2535_v48 = vpop.f32.mrb[25].mxu1 }
 0x234   : > { %v999_v55 = vmul.f32 0.35355338, %v853_v47  ;;  %v902_v56 = vpop.f32.mrb[26].mxu1  ;;  %1047 = vmax.xlane.f32.xlu0 %v1046_v49  ;;  %v2529_v57 = vpop.f32.mrb[9].mxu0 }
 0x235   : > { %v856_v58 = vpop.f32.mrb[10].mxu0  ;;  %v2536_v59 = vpop.f32.mrb[27].mxu1  ;;  %v1042_v60 = vadd.f32 %v3319_v43, %v1000_v46 }
 0x236   : > { %v2530_v61 = vpop.f32.mrb[11].mxu0  ;;  %v1041_v1 = vadd.f32 %v3323_v54, %v999_v55 }
 0x237   : > { %v1055_v63 = vsel %vm1045_vm6, %v1042_v60, -inf }
 0x238   : > { %1056 = vmax.xlane.f32.xlu1 %v1055_v63  ;;  %v1052_v15 = vsel %vm1045_vm6, %v1041_v1, -inf }
 0x23a   : > { %v991_v8 = vpop.f32.mrb[28].mxu1 }
 0x23b   : > { %v1002_v10 = vmul.f32 0.35355338, %v991_v8  ;;  %v945_v13 = vpop.f32.mrb[12].mxu0  ;;  %v2547_v14 = vpop.f32.mrb[29].mxu1 }
 0x23c   : > { %v1001_v16 = vmul.f32 0.35355338, %v945_v13  ;;  %v994_v19 = vpop.f32.mrb[30].mxu1  ;;  %1053 = vmax.xlane.f32.xlu1 %v1052_v15  ;;  %v2541_v20 = vpop.f32.mrb[13].mxu0 }
 0x23d   : > { %v948_v21 = vpop.f32.mrb[14].mxu0  ;;  %v2548_v23 = vpop.f32.mrb[31].mxu1  ;;  %v1044_v24 = vadd.f32 %v3328_v7, %v1002_v10 }
 0x23e   : > { %v2542_v18 = vpop.f32.mrb[15].mxu0  ;;  %v1043_v25 = vadd.f32 %v3330_v9, %v1001_v16 }
 0x23f   : > { %v1061_v26 = vsel %vm1045_vm6, %v1044_v24, -inf }
 0x240   : > { %1062 = vmax.xlane.f32.xlu1 %v1061_v26  ;;  %v1058_v17 = vsel %vm1045_vm6, %v1043_v25, -inf }
 0x241   : > { %1059 = vmax.xlane.f32.xlu0 %v1058_v17 }
 0x251   : > { %1166 = vrot.lane.b32.xlu1 %v3230_v35, %s2953_s19 }
 0x255   : > { %1213 = vrot.lane.b32.xlu1 %v3249_v53, %s2953_s19 }
 0x257   : > { %1119 = vrot.lane.b32.xlu0 %v3232_v36, %s2953_s19 }
 0x259   : > { %1260 = vrot.lane.b32.xlu1 %v3245_v51, %s2953_s19 }
 0x2bd   : > { %v1051_v27 = vpop.xlane.xlu0 %1050 }
 0x2be   : > { %v1065_v29 = vsub.f32 %v1040_v32, %v1051_v27 }
 0x2c0   : > { %v1072_v30 = vmul.f32 1.442695, %v1065_v29 }
 0x2c1   : > { %v1048_v31 = vpop.xlane.xlu0 %1047 }
 0x2c2   : > { %2754 = vpow2.f32 %v1072_v30  ;;  %v1064_v33 = vsub.f32 %v1039_v40, %v1048_v31 }
 0x2c4   : > { %v1070_v34 = vmul.f32 1.442695, %v1064_v33 }
 0x2c5   : > { %v1057_v37 = vpop.xlane.xlu1 %1056 }
 0x2c6   : > { %2756 = vpow2.f32 %v1070_v34  ;;  %v1067_v38 = vsub.f32 %v1042_v60, %v1057_v37 }
 0x2c8   : > { %v1076_v39 = vmul.f32 1.442695, %v1067_v38 }
 0x2c9   : > { %v1054_v41 = vpop.xlane.xlu1 %1053 }
 0x2ca   : > { %2758 = vpow2.f32 %v1076_v39  ;;  %v1066_v42 = vsub.f32 %v1041_v1, %v1054_v41 }
 0x2cc   : > { %v2755_v44 = vpop.eup %2754  ;;  %v1074_v45 = vmul.f32 1.442695, %v1066_v42 }
 0x2cd   : > { %v1063_v46 = vpop.xlane.xlu1 %1062  ;;  %v1085_v47 = vsel %vm1045_vm6, %v2755_v44, 0.0 }
 0x2ce   : > { %2760 = vpow2.f32 %v1074_v45  ;;  %1086 = vadd.xlane.f32.xlu1 %v1085_v47  ;;  %v1060_v32 = vpop.xlane.xlu0 %1059  ;;  %v1069_v60 = vsub.f32 %v1044_v24, %v1063_v46 }
 0x2cf   : > { %v1068_v62 = vsub.f32 %v1043_v25, %v1060_v32 }
 0x2d0   : > { %v2757_v48 = vpop.eup %2756  ;;  %v1080_v61 = vmul.f32 1.442695, %v1069_v60 }
 0x2d1   : > { %v1167_v49 = vpop.permute.xlu1 %1166  ;;  %v1082_v40 = vsel %vm1045_vm6, %v2757_v48, 0.0  ;;  %v1078_v63 = vmul.f32 1.442695, %v1068_v62 }
 0x2d2   : > { %2556 = vmatpush3.bf16.msra.mxu1 %v1167_v49  ;;  %1083 = vadd.xlane.f32.xlu0 %v1082_v40  ;;  %v1120_v55 = vpop.permute.xlu0 %1119  ;;  %2762 = vpow2.f32 %v1080_v61 }
 0x2d3   : > { %2550 = vmatpush3.bf16.msra.mxu0 %v1120_v55  ;;  %2567 = vmatprep.subr.bf16.mxu1 %v2950_v0  ;;  %2764 = vpow2.f32 %v1078_v63 }
 0x2d4   : > { %v2759_v56 = vpop.eup %2758  ;;  %2561 = vmatprep.subr.bf16.mxu0 %v2950_v0 }
 0x2d5   : > { %v1091_v57 = vsel %vm1045_vm6, %v2759_v56, 0.0 }
 0x2d6   : > { %1092 = vadd.xlane.f32.xlu1 %v1091_v57 }
 0x2d8   : > { %v2761_v58 = vpop.eup %2760 }
 0x2d9   : > { %v1088_v59 = vsel %vm1045_vm6, %v2761_v58, 0.0 }
 0x2da   : > { %1089 = vadd.xlane.f32.xlu0 %v1088_v59 }
 0x2dc   : > { %v3355_v1 = vpop.eup %2762 }
 0x2dd   : > { %v1097_v2 = vsel %vm1045_vm6, %v3355_v1, 0.0  ;;  %v3359_v8 = vpop.eup %2764 }
 0x2de   : > { %v1094_v10 = vsel %vm1045_vm6, %v3359_v8, 0.0 }
 0x2e7   : > { %1354 = vrot.lane.b32.xlu1 %v3267_v4, %s2953_s19 }
 0x2f0   : > { %1307 = vrot.lane.b32.xlu0 %v3271_v6, %s2953_s19  ;;  %s2957_s19 = smov [#allocation8]  }
 0x30b   : > { %1098 = vadd.xlane.f32.xlu1 %v1097_v2 }
 0x30f   : > { %1095 = vadd.xlane.f32.xlu0 %v1094_v10 }
 0x31c   : > { %1460 = vrot.lane.b32.xlu1 %v3230_v35, %s2954_s27 }
 0x320   : > { %1458 = vrot.lane.b32.xlu1 %v3243_v50, %s2954_s27  ;;  %v1214_v50 = vpop.permute.xlu1 %1213 }
 0x324   : > { %1562 = vrot.lane.b32.xlu1 %v3245_v51, %s2954_s27  ;;  %v1261_v13 = vpop.permute.xlu1 %1260 }
 0x325   : > { %1409 = vrot.lane.b32.xlu0 %v3232_v36, %s2954_s27 }
 0x328   : > { %1560 = vrot.lane.b32.xlu1 %v3265_v3, %s2954_s27 }
 0x329   : > { %1407 = vrot.lane.b32.xlu0 %v3247_v52, %s2954_s27 }
 0x32c   : > { %1664 = vrot.lane.b32.xlu1 %v3267_v4, %s2954_s27 }
 0x32d   : > { %1511 = vrot.lane.b32.xlu0 %v3249_v53, %s2954_s27 }
 0x330   : > { %1662 = vrot.lane.b32.xlu1 %v3289_v11, %s2954_s27 }
 0x331   : > { %1509 = vrot.lane.b32.xlu0 %v3269_v5, %s2954_s27 }
 0x335   : > { %1613 = vrot.lane.b32.xlu0 %v3271_v6, %s2954_s27 }
 0x339   : > { %1611 = vrot.lane.b32.xlu0 %v3291_v12, %s2954_s27  ;;  %s2878_s27 = sshll.u32 %s2957_s19, 4  ;;  %s2879_s27 = int_to_ptr.vmem [resolvable:$false] %s2878_s27 }
 0x33a   : > { %p2881_p7 = scmp.lt.s32.totalorder %s3518_s28, %s2879_s27 }
 0x35b   : > { %v1087_v14 = vpop.xlane.xlu1 %1086 }
 0x35c   : > { %2766 = vrcp.f32 %v1087_v14 }
 0x35f   : > { %v1084_v15 = vpop.xlane.xlu0 %1083 }
 0x360   : > { %2768 = vrcp.f32 %v1084_v15 }
 0x363   : > { %v1093_v3 = vpop.xlane.xlu1 %1092 }
 0x364   : > { %2770 = vrcp.f32 %v1093_v3 }
 0x366   : > { %v2767_v52 = vpop.eup %2766 }
 0x367   : > { %v1107_v16 = vmul.f32 %v2767_v52, %v2755_v44  ;;  %v1090_v19 = vpop.xlane.xlu0 %1089  ;;  %v1355_v25 = vpop.permute.xlu1 %1354 }
 0x368   : > { %2772 = vrcp.f32 %v1090_v19 }
 0x369   : > { %v1113_v20 = vpack.c.bf16 %v1107_v16, %v1107_v16 }
 0x36a   : > { %v2769_v11 = vpop.eup %2768 }
 0x36b   : > { %v1106_v21 = vmul.f32 %v2769_v11, %v2757_v48  ;;  %2558 = vmatmul.mubr.msk.bf16.vlgmr.msra.gmra.mrb[32].mxu1 %vm1045_vm6, %v1113_v20  ;;  %v1308_v27 = vpop.permute.xlu0 %1307 }
 0x36c   : > { %2568 = vmatpush3.bf16.msra.mxu1 %v1261_v13  ;;  %2569 = vmatprep.mubr.msk.bf16.mxu1 %vm2951_vm0, %v2950_v0 }
 0x36d   : > { %v1112_v5 = vpack.c.bf16 %v1106_v21, %v1106_v21  ;;  %2579 = vmatprep.subr.bf16.mxu1 %v2950_v0 }
 0x36e   : > { %v2771_v12 = vpop.eup %2770 }
 0x36f   : > { %v1109_v23 = vmul.f32 %v2771_v12, %v2759_v56  ;;  %2552 = vmatmul.mubr.msk.bf16.vlgmr.msra.gmra.mrb[16].mxu0 %vm1045_vm6, %v1112_v5 }
 0x370   : > { %2562 = vmatpush3.bf16.msra.mxu0 %v1214_v50  ;;  %2563 = vmatprep.mubr.msk.bf16.mxu0 %vm2951_vm0, %v2950_v0 }
 0x371   : > { %v1115_v24 = vpack.c.bf16 %v1109_v23, %v1109_v23  ;;  %2573 = vmatprep.subr.bf16.mxu0 %v2950_v0 }
 0x372   : > { %v2773_v18 = vpop.eup %2772 }
 0x373   : > { %v1108_v26 = vmul.f32 %v2773_v18, %v2761_v58  ;;  %2570 = vmatmul.mubr.msk.bf16.vlgmr.msra.gmra.mrb[36].mxu1 %vm1045_vm6, %v1115_v24 }
 0x374   : > { %2580 = vmatpush3.bf16.msra.mxu1 %v1355_v25  ;;  %2581 = vmatprep.mubr.msk.bf16.mxu1 %vm2951_vm0, %v2950_v0 }
 0x375   : > { %v1114_v17 = vpack.c.bf16 %v1108_v26, %v1108_v26  ;;  %2591 = vmatprep.subr.bf16.mxu1 %v2950_v0 }
 0x377   : > { %2564 = vmatmul.mubr.msk.bf16.vlgmr.msra.gmra.mrb[20].mxu0 %vm1045_vm6, %v1114_v17 }
 0x378   : > { %2574 = vmatpush3.bf16.msra.mxu0 %v1308_v27  ;;  %2575 = vmatprep.mubr.msk.bf16.mxu0 %vm2951_vm0, %v2950_v0 }
 0x379   : > { %2585 = vmatprep.subr.bf16.mxu0 %v2950_v0 }
 0x398   : > { %v1099_v29 = vpop.xlane.xlu1 %1098 }
 0x399   : > { %2774 = vrcp.f32 %v1099_v29 }
 0x39c   : > { %v1096_v30 = vpop.xlane.xlu0 %1095  ;;  %v1461_v31 = vpop.permute.xlu1 %1460 }
 0x39d   : > { %2776 = vrcp.f32 %v1096_v30  ;;  %v1466_v44 = vsel %vm720_vm2, %v1461_v31, 0 }
 0x3a0   : > { %v1410_v33 = vpop.permute.xlu0 %1409  ;;  %v1459_v37 = vpop.permute.xlu1 %1458 }
 0x3a1   : > { %v1415_v32 = vsel %vm720_vm2, %v1410_v33, 0 }
 0x3a3   : > { %v2775_v34 = vpop.eup %2774 }
 0x3a4   : > { %v1111_v38 = vmul.f32 %v2775_v34, %v3355_v1  ;;  %v1408_v42 = vpop.permute.xlu0 %1407  ;;  %v1563_v46 = vpop.permute.xlu1 %1562 }
 0x3a5   : > { %v1568_v40 = vsel %vm720_vm2, %v1563_v46, 0 }
 0x3a6   : > { %v1117_v39 = vpack.c.bf16 %v1111_v38, %v1111_v38 }
 0x3a7   : > { %v2777_v41 = vpop.eup %2776 }
 0x3a8   : > { %v1110_v45 = vmul.f32 %v2777_v41, %v3359_v8  ;;  %2582 = vmatmul.mubr.msk.bf16.vlgmr.msra.gmra.mrb[40].mxu1 %vm1045_vm6, %v1117_v39  ;;  %v1512_v48 = vpop.permute.xlu0 %1511  ;;  %v1561_v49 = vpop.permute.xlu1 %1560 }
 0x3a9   : > { %2592 = vmatpush3.bf16.xpose.msra.mxu1 %v1466_v44  ;;  %2593 = vmatprep.mubr.msk.bf16.mxu1 %vm2951_vm0, %v2950_v0  ;;  %v1517_v56 = vsel %vm720_vm2, %v1512_v48, 0 }
 0x3aa   : > { %v1116_v47 = vpack.c.bf16 %v1110_v45, %v1110_v45  ;;  %2603 = vmatprep.subr.bf16.mxu1 %v2950_v0 }
 0x3ac   : > { %2576 = vmatmul.mubr.msk.bf16.vlgmr.msra.gmra.mrb[24].mxu0 %vm1045_vm6, %v1116_v47  ;;  %v1510_v55 = vpop.permute.xlu0 %1509  ;;  %v1665_v57 = vpop.permute.xlu1 %1664 }
 0x3ad   : > { %2586 = vmatpush3.bf16.xpose.msra.mxu0 %v1415_v32  ;;  %2587 = vmatprep.mubr.msk.bf16.mxu0 %vm2951_vm0, %v2950_v0  ;;  %v1670_v58 = vsel %vm720_vm2, %v1665_v57, 0 }
 0x3ae   : > { %2597 = vmatprep.subr.bf16.mxu0 %v2950_v0 }
 0x3b0   : > { %2594 = vmatmul.mubr.msk.bf16.vlgmr.msra.gmra.mrb[44].mxu1 %vm720_vm2, %v1459_v37  ;;  %v1614_v59 = vpop.permute.xlu0 %1613  ;;  %v1663_v61 = vpop.permute.xlu1 %1662 }
 0x3b1   : > { %2604 = vmatpush3.bf16.xpose.msra.mxu1 %v1568_v40  ;;  %2605 = vmatprep.mubr.msk.bf16.mxu1 %vm2951_vm0, %v2950_v0  ;;  %v1619_v60 = vsel %vm720_vm2, %v1614_v59, 0 }
 0x3b2   : > { %2615 = vmatprep.subr.bf16.mxu1 %v2950_v0 }
 0x3b4   : > { %2588 = vmatmul.mubr.msk.bf16.vlgmr.msra.gmra.mrb[28].mxu0 %vm720_vm2, %v1408_v42  ;;  %v1612_v62 = vpop.permute.xlu0 %1611 }
 0x3b5   : > { %2598 = vmatpush3.bf16.xpose.msra.mxu0 %v1517_v56  ;;  %2599 = vmatprep.mubr.msk.bf16.mxu0 %vm2951_vm0, %v2950_v0 }
 0x3b6   : > { %2609 = vmatprep.subr.bf16.mxu0 %v2950_v0 }
 0x3b8   : > { %2606 = vmatmul.mubr.msk.bf16.vlgmr.msra.gmra.mrb[48].mxu1 %vm720_vm2, %v1561_v49 }
 0x3b9   : > { %2616 = vmatpush3.bf16.xpose.msra.mxu1 %v1670_v58  ;;  %2617 = vmatprep.mubr.msk.bf16.mxu1 %vm2951_vm0, %v2950_v0 }
 0x3ba   : > { %2627 = vmatprep.subr.bf16.mxu1 %v2950_v0 }
 0x3bc   : > { %2600 = vmatmul.mubr.msk.bf16.vlgmr.msra.gmra.mrb[32].mxu0 %vm720_vm2, %v1510_v55 }
 0x3bd   : > { %2610 = vmatpush3.bf16.xpose.msra.mxu0 %v1619_v60  ;;  %2611 = vmatprep.mubr.msk.bf16.mxu0 %vm2951_vm0, %v2950_v0 }
 0x3be   : > { %2621 = vmatprep.subr.bf16.mxu0 %v2950_v0 }
 0x3c0   : > { %2618 = vmatmul.mubr.msk.bf16.vlgmr.msra.gmra.mrb[52].mxu1 %vm720_vm2, %v1663_v61 }
 0x3c1   : > { %2629 = vmatprep.mubr.msk.bf16.mxu1 %vm2951_vm0, %v2950_v0 }
 0x3c4   : > { %2612 = vmatmul.mubr.msk.bf16.vlgmr.msra.gmra.mrb[36].mxu0 %vm720_vm2, %v1612_v62 }
 0x3c5   : > { %2623 = vmatprep.mubr.msk.bf16.mxu0 %vm2951_vm0, %v2950_v0 }
 0x43e   : > { %v1206_v63 = vpop.f32.mrb[32].mxu1 }
 0x43f   : > { %1401 = vst.msk [vmem:[#allocation2 + $0x8] sm:$0xff] %vm720_vm2, %v1206_v63  ;;  %v2559_v1 = vpop.f32.mrb[33].mxu1 }
 0x440   : > { %v1209_v2 = vpop.f32.mrb[34].mxu1 }
 0x441   : > { %v2560_v8 = vpop.f32.mrb[35].mxu1 }
 0x442   : > { %v1159_v10 = vpop.f32.mrb[16].mxu0 }
 0x443   : > { %1400 = vst.msk [vmem:[#allocation2] sm:$0xff] %vm720_vm2, %v1159_v10  ;;  %v2553_v50 = vpop.f32.mrb[17].mxu0 }
 0x444   : > { %v1162_v13 = vpop.f32.mrb[18].mxu0 }
 0x445   : > { %v2554_v14 = vpop.f32.mrb[19].mxu0 }
 0x446   : > { %v1300_v15 = vpop.f32.mrb[36].mxu1 }
 0x447   : > { %1403 = vst.msk [vmem:[#allocation2 + $0x18] sm:$0xff] %vm720_vm2, %v1300_v15  ;;  %v2571_v3 = vpop.f32.mrb[37].mxu1 }
 0x448   : > { %v1303_v52 = vpop.f32.mrb[38].mxu1 }
 0x449   : > { %v2572_v16 = vpop.f32.mrb[39].mxu1 }
 0x44a   : > { %v1253_v19 = vpop.f32.mrb[20].mxu0 }
 0x44b   : > { %1402 = vst.msk [vmem:[#allocation2 + $0x10] sm:$0xff] %vm720_vm2, %v1253_v19  ;;  %v2565_v20 = vpop.f32.mrb[21].mxu0 }
 0x44c   : > { %v1256_v11 = vpop.f32.mrb[22].mxu0 }
 0x44d   : > { %v2566_v21 = vpop.f32.mrb[23].mxu0 }
 0x47b   : > { %v1394_v5 = vpop.f32.mrb[40].mxu1 }
 0x47c   : > { %1405 = vst.msk [vmem:[#allocation2 + $0x28] sm:$0xff] %vm720_vm2, %v1394_v5  ;;  %v2583_v12 = vpop.f32.mrb[41].mxu1 }
 0x47d   : > { %v1397_v23 = vpop.f32.mrb[42].mxu1 }
 0x47e   : > { %v2584_v24 = vpop.f32.mrb[43].mxu1 }
 0x47f   : > { %v1347_v18 = vpop.f32.mrb[24].mxu0 }
 0x480   : > { %1404 = vst.msk [vmem:[#allocation2 + $0x20] sm:$0xff] %vm720_vm2, %v1347_v18  ;;  %v2577_v25 = vpop.f32.mrb[25].mxu0 }
 0x481   : > { %v1350_v26 = vpop.f32.mrb[26].mxu0 }
 0x482   : > { %v2578_v17 = vpop.f32.mrb[27].mxu0 }
 0x483   : > { %v1502_v27 = vpop.f32.mrb[44].mxu1 }
 0x484   : > { %v1713_v29 = vmul.f32 0.35355338, %v1502_v27  ;;  %v2595_v30 = vpop.f32.mrb[45].mxu1 }
 0x485   : > { %v1505_v31 = vpop.f32.mrb[46].mxu1 }
 0x486   : > { %v2596_v33 = vpop.f32.mrb[47].mxu1  ;;  %v1719_v34 = vadd.f32 %v1713_v29, %v3310_v22 }
 0x487   : > { %v1451_v37 = vpop.f32.mrb[28].mxu0 }
 0x488   : > { %v1712_v38 = vmul.f32 0.35355338, %v1451_v37  ;;  %v2589_v39 = vpop.f32.mrb[29].mxu0  ;;  %v1727_v41 = vsel %vm1045_vm6, %v1719_v34, -inf }
 0x489   : > { %1728 = vmax.xlane.f32.xlu1 %v1727_v41  ;;  %v1454_v42 = vpop.f32.mrb[30].mxu0 }
 0x48a   : > { %v2590_v44 = vpop.f32.mrb[31].mxu0  ;;  %v1718_v45 = vadd.f32 %v1712_v38, %v3313_v28 }
 0x48b   : > { %v1604_v46 = vpop.f32.mrb[48].mxu1 }
 0x48c   : > { %v2607_v47 = vpop.f32.mrb[49].mxu1  ;;  %v1724_v32 = vsel %vm1045_vm6, %v1718_v45, -inf  ;;  %v1715_v55 = vmul.f32 0.35355338, %v1604_v46 }
 0x48d   : > { %v1607_v48 = vpop.f32.mrb[50].mxu1  ;;  %1725 = vmax.xlane.f32.xlu0 %v1724_v32 }
 0x48e   : > { %v2608_v49 = vpop.f32.mrb[51].mxu1  ;;  %v1721_v63 = vadd.f32 %v1715_v55, %v3319_v43 }
 0x48f   : > { %v1553_v40 = vpop.f32.mrb[32].mxu0 }
 0x490   : > { %v1714_v22 = vmul.f32 0.35355338, %v1553_v40  ;;  %v2601_v56 = vpop.f32.mrb[33].mxu0  ;;  %v1733_v15 = vsel %vm1045_vm6, %v1721_v63, -inf }
 0x491   : > { %v1556_v57 = vpop.f32.mrb[34].mxu0 }
 0x492   : > { %v2602_v58 = vpop.f32.mrb[35].mxu0  ;;  %v1720_v59 = vadd.f32 %v1714_v22, %v3323_v54 }
 0x493   : > { %v1706_v60 = vpop.f32.mrb[52].mxu1 }
 0x494   : > { %v1717_v61 = vmul.f32 0.35355338, %v1706_v60  ;;  %v2619_v62 = vpop.f32.mrb[53].mxu1  ;;  %v1730_v28 = vsel %vm1045_vm6, %v1720_v59, -inf }
 0x495   : > { %v1709_v1 = vpop.f32.mrb[54].mxu1  ;;  %1731 = vmax.xlane.f32.xlu0 %v1730_v28 }
 0x496   : > { %v2620_v2 = vpop.f32.mrb[55].mxu1  ;;  %v1723_v8 = vadd.f32 %v1717_v61, %v3328_v7 }
 0x497   : > { %v1655_v10 = vpop.f32.mrb[36].mxu0 }
 0x498   : > { %v1716_v50 = vmul.f32 0.35355338, %v1655_v10  ;;  %v2613_v13 = vpop.f32.mrb[37].mxu0  ;;  %v1739_v14 = vsel %vm1045_vm6, %v1723_v8, -inf }
 0x499   : > { %1740 = vmax.xlane.f32.xlu1 %v1739_v14  ;;  %1734 = vmax.xlane.f32.xlu0 %v1733_v15  ;;  %v1658_v54 = vpop.f32.mrb[38].mxu0 }
 0x49a   : > { %v2614_v3 = vpop.f32.mrb[39].mxu0  ;;  %v1722_v52 = vadd.f32 %v1716_v50, %v3330_v9 }
 0x49b   : > { %v2753_v3 = vld [vmem:[%s3577_s7] sm:$0xff]  }
 0x49c   : > { %v1736_v43 = vsel %vm1045_vm6, %v1722_v52, -inf }
 0x49d   : > { %1737 = vmax.xlane.f32.xlu0 %v1736_v43 }
 0x516   : > { %v1729_v16 = vpop.xlane.xlu1 %1728 }
 0x517   : > { %v1743_v19 = vsub.f32 %v1719_v34, %v1729_v16 }
 0x519   : > { %v1750_v20 = vmul.f32 1.442695, %v1743_v19 }
 0x51a   : > { %v1726_v7 = vpop.xlane.xlu0 %1725 }
 0x51b   : > { %2778 = vpow2.f32 %v1750_v20  ;;  %v1742_v11 = vsub.f32 %v1718_v45, %v1726_v7 }
 0x51d   : > { %v1748_v21 = vmul.f32 1.442695, %v1742_v11 }
 0x51f   : > { %2780 = vpow2.f32 %v1748_v21 }
 0x522   : > { %v1732_v9 = vpop.xlane.xlu0 %1731 }
 0x523   : > { %v1744_v25 = vsub.f32 %v1720_v59, %v1732_v9 }
 0x525   : > { %v2779_v5 = vpop.eup %2778  ;;  %v1752_v27 = vmul.f32 1.442695, %v1744_v25 }
 0x526   : > { %v1763_v12 = vsel %vm1045_vm6, %v2779_v5, 0.0  ;;  %v1735_v18 = vpop.xlane.xlu0 %1734  ;;  %v1741_v30 = vpop.xlane.xlu1 %1740 }
 0x527   : > { %1764 = vadd.xlane.f32.xlu1 %v1763_v12  ;;  %v1745_v17 = vsub.f32 %v1721_v63, %v1735_v18  ;;  %2782 = vpow2.f32 %v1752_v27 }
 0x529   : > { %v2781_v23 = vpop.eup %2780  ;;  %v1754_v31 = vmul.f32 1.442695, %v1745_v17 }
 0x52a   : > { %v1760_v24 = vsel %vm1045_vm6, %v2781_v23, 0.0  ;;  %v1738_v26 = vpop.xlane.xlu0 %1737 }
 0x52b   : > { %1761 = vadd.xlane.f32.xlu0 %v1760_v24  ;;  %v1746_v29 = vsub.f32 %v1722_v52, %v1738_v26  ;;  %2784 = vpow2.f32 %v1754_v31 }
 0x52d   : > { %v1756_v33 = vmul.f32 1.442695, %v1746_v29 }
 0x52f   : > { %2786 = vpow2.f32 %v1756_v33 }
 0x531   : > { %v2783_v34 = vpop.eup %2782 }
 0x532   : > { %v1766_v37 = vsel %vm1045_vm6, %v2783_v34, 0.0 }
 0x538   : > { %1842 = vrot.lane.b32.xlu1 %v3230_v35, %s2955_s0  ;;  %v1747_v35 = vsub.f32 %v1723_v8, %v1741_v30 }
 0x53c   : > { %1888 = vrot.lane.b32.xlu1 %v3249_v53, %s2955_s0  ;;  %v1758_v53 = vmul.f32 1.442695, %v1747_v35 }
 0x53e   : > { %2788 = vpow2.f32 %v1758_v53 }
 0x540   : > { %1934 = vrot.lane.b32.xlu1 %v3245_v51, %s2955_s0  ;;  %v2785_v51 = vpop.eup %2784 }
 0x541   : > { %1796 = vrot.lane.b32.xlu0 %v3232_v36, %s2955_s0  ;;  %v2787_v36 = vpop.eup %2786  ;;  %v1769_v38 = vsel %vm1045_vm6, %v2785_v51, 0.0 }
 0x542   : > { %v1772_v39 = vsel %vm1045_vm6, %v2787_v36, 0.0 }
 0x548   : > { %v2789_v41 = vpop.eup %2788 }
 0x549   : > { %v1775_v42 = vsel %vm1045_vm6, %v2789_v41, 0.0 }
 0x560   : > { %1767 = vadd.xlane.f32.xlu0 %v1766_v37 }
 0x564   : > { %1770 = vadd.xlane.f32.xlu1 %v1769_v38  ;;  %1773 = vadd.xlane.f32.xlu0 %v1772_v39 }
 0x568   : > { %1776 = vadd.xlane.f32.xlu1 %v1775_v42 }
 0x579   : > { %2026 = vrot.lane.b32.xlu1 %v3267_v4, %s2955_s0 }
 0x57a   : > { %1980 = vrot.lane.b32.xlu0 %v3271_v6, %s2955_s0  ;;  %s2880_s0 = scalar_lea.vmem %s2879_s27, 1536 }
 0x57b   : > { %p2882_p9 = scmp.lt.s32.totalorder %s2880_s0, %s2874_s11 }
 0x57d   : > { %p2883_p11 = por %p2882_p9, %p2881_p7 }
 0x57f   : > { %p2884_p3 = pnand %p2883_p11, %p2877_p5 }
 0x5b4   : > { %v1765_v44 = vpop.xlane.xlu1 %1764 }
 0x5b5   : > { %2790 = vrcp.f32 %v1765_v44 }
 0x5b8   : > { %v1843_v45 = vpop.permute.xlu1 %1842  ;;  %v1762_v46 = vpop.xlane.xlu0 %1761 }
 0x5b9   : > { %2792 = vrcp.f32 %v1762_v46  ;;  %2628 = vmatpush3.bf16.msra.mxu1 %v1843_v45 }
 0x5ba   : > { %2639 = vmatprep.subr.bf16.mxu1 %v2950_v0 }
 0x5bc   : > { %v1797_v47 = vpop.permute.xlu0 %1796  ;;  %v1889_v32 = vpop.permute.xlu1 %1888 }
 0x5bd   : > { %2622 = vmatpush3.bf16.msra.mxu0 %v1797_v47 }
 0x5be   : > { %2633 = vmatprep.subr.bf16.mxu0 %v2950_v0 }
 0x5bf   : > { %v2791_v48 = vpop.eup %2790 }
 0x5c0   : > { %v1785_v49 = vmul.f32 %v2791_v48, %v2779_v5  ;;  %v1935_v22 = vpop.permute.xlu1 %1934 }
 0x5c2   : > { %v1791_v40 = vpack.c.bf16 %v1785_v49, %v1785_v49 }
 0x5c3   : > { %v2793_v4 = vpop.eup %2792 }
 0x5c4   : > { %v1784_v55 = vmul.f32 %v2793_v4, %v2781_v23  ;;  %2630 = vmatmul.mubr.msk.bf16.vlgmr.msra.gmra.mrb[56].mxu1 %vm1045_vm6, %v1791_v40 }
 0x5c5   : > { %2640 = vmatpush3.bf16.msra.mxu1 %v1935_v22  ;;  %2641 = vmatprep.mubr.msk.bf16.mxu1 %vm2951_vm0, %v2950_v0 }
 0x5c6   : > { %v1790_v6 = vpack.c.bf16 %v1784_v55, %v1784_v55  ;;  %2651 = vmatprep.subr.bf16.mxu1 %v2950_v0 }
 0x5c8   : > { %2624 = vmatmul.mubr.msk.bf16.vlgmr.msra.gmra.mrb[40].mxu0 %vm1045_vm6, %v1790_v6 }
 0x5c9   : > { %2634 = vmatpush3.bf16.msra.mxu0 %v1889_v32  ;;  %2635 = vmatprep.mubr.msk.bf16.mxu0 %vm2951_vm0, %v2950_v0 }
 0x5ca   : > { %2645 = vmatprep.subr.bf16.mxu0 %v2950_v0 }
 0x5ed   : > { %v1768_v56 = vpop.xlane.xlu0 %1767 }
 0x5ee   : > { %2794 = vrcp.f32 %v1768_v56 }
 0x5f1   : > { %v1771_v57 = vpop.xlane.xlu1 %1770  ;;  %v1774_v58 = vpop.xlane.xlu0 %1773 }
 0x5f2   : > { %2796 = vrcp.f32 %v1771_v57 }
 0x5f3   : > { %2798 = vrcp.f32 %v1774_v58 }
 0x5f5   : > { %v1777_v59 = vpop.xlane.xlu1 %1776  ;;  %v1981_v2 = vpop.permute.xlu0 %1980 }
 0x5f6   : > { %2800 = vrcp.f32 %v1777_v59 }
 0x5f8   : > { %v2795_v60 = vpop.eup %2794 }
 0x5f9   : > { %v1786_v61 = vmul.f32 %v2795_v60, %v2783_v34  ;;  %v2027_v13 = vpop.permute.xlu1 %2026 }
 0x5fb   : > { %v1792_v62 = vpack.c.bf16 %v1786_v61, %v1786_v61 }
 0x5fc   : > { %v2797_v28 = vpop.eup %2796 }
 0x5fd   : > { %v2799_v63 = vpop.eup %2798  ;;  %v1787_v1 = vmul.f32 %v2797_v28, %v2785_v51  ;;  %2636 = vmatmul.mubr.msk.bf16.vlgmr.msra.gmra.mrb[44].mxu0 %vm1045_vm6, %v1792_v62 }
 0x5fe   : > { %2646 = vmatpush3.bf16.msra.mxu0 %v1981_v2  ;;  %2647 = vmatprep.mubr.msk.bf16.mxu0 %vm2951_vm0, %v2950_v0  ;;  %v1788_v8 = vmul.f32 %v2799_v63, %v2787_v36 }
 0x5ff   : > { %v1793_v10 = vpack.c.bf16 %v1787_v1, %v1787_v1  ;;  %2657 = vmatprep.subr.bf16.mxu0 %v2950_v0 }
 0x600   : > { %v2801_v50 = vpop.eup %2800  ;;  %v1794_v15 = vpack.c.bf16 %v1788_v8, %v1788_v8 }
 0x601   : > { %2642 = vmatmul.mubr.msk.bf16.vlgmr.msra.gmra.mrb[60].mxu1 %vm1045_vm6, %v1793_v10  ;;  %v1789_v14 = vmul.f32 %v2801_v50, %v2789_v41 }
 0x602   : > { %2652 = vmatpush3.bf16.msra.mxu1 %v2027_v13  ;;  %2653 = vmatprep.mubr.msk.bf16.mxu1 %vm2951_vm0, %v2950_v0 }
 0x603   : > { %v1795_v54 = vpack.c.bf16 %v1789_v14, %v1789_v14 }
 0x605   : > { %2648 = vmatmul.mubr.msk.bf16.vlgmr.msra.gmra.mrb[48].mxu0 %vm1045_vm6, %v1794_v15 }
 0x606   : > { %2659 = vmatprep.mubr.msk.bf16.mxu0 %vm2951_vm0, %v2950_v0  ;;  %2658 = vmatpush3.bf16.msra.mxu0 %v2753_v3 }
 0x609   : > { %2654 = vmatmul.mubr.msk.bf16.vlgmr.msra.gmra.mrb[64].mxu1 %vm1045_vm6, %v1795_v54 }
 0x697   : > { %v1882_v52 = vpop.f32.mrb[56].mxu1 }
 0x698   : > { %v2631_v43 = vpop.f32.mrb[57].mxu1  ;;  %2080 = vrot.lane.b32.xlu1 %v1882_v52, %s2956_s16 }
 0x699   : > { %v1885_v16 = vpop.f32.mrb[58].mxu1 }
 0x69a   : > { %v2632_v19 = vpop.f32.mrb[59].mxu1 }
 0x69b   : > { %v1836_v20 = vpop.f32.mrb[40].mxu0 }
 0x69c   : > { %2078 = vrot.lane.b32.xlu0 %v1836_v20, %s2956_s16  ;;  %v2625_v7 = vpop.f32.mrb[41].mxu0 }
 0x69d   : > { %v1839_v11 = vpop.f32.mrb[42].mxu0 }
 0x69e   : > { %v2626_v21 = vpop.f32.mrb[43].mxu0  ;;  %v2403_v11 = vld [vmem:[%s3578_s8] ss:$0 sm:$0xff] }
 0x6d0   : > { %v1928_v5 = vpop.f32.mrb[44].mxu0 }
 0x6d1   : > { %2082 = vrot.lane.b32.xlu0 %v1928_v5, %s2956_s16  ;;  %v2637_v12 = vpop.f32.mrb[45].mxu0 }
 0x6d2   : > { %v1931_v23 = vpop.f32.mrb[46].mxu0 }
 0x6d3   : > { %v2638_v24 = vpop.f32.mrb[47].mxu0 }
 0x6d4   : > { %v1974_v9 = vpop.f32.mrb[60].mxu1 }
 0x6d5   : > { %2084 = vrot.lane.b32.xlu1 %v1974_v9, %s2956_s16  ;;  %v2643_v18 = vpop.f32.mrb[61].mxu1 }
 0x6d6   : > { %v1977_v25 = vpop.f32.mrb[62].mxu1 }
 0x6d7   : > { %v2644_v26 = vpop.f32.mrb[63].mxu1 }
 0x6d8   : > { %v2020_v17 = vpop.f32.mrb[48].mxu0 }
 0x6d9   : > { %2086 = vrot.lane.b32.xlu0 %v2020_v17, %s2956_s16  ;;  %v2649_v27 = vpop.f32.mrb[49].mxu0 }
 0x6da   : > { %v2023_v29 = vpop.f32.mrb[50].mxu0 }
 0x6db   : > { %v2650_v30 = vpop.f32.mrb[51].mxu0 }
 0x6dc   : > { %v2066_v31 = vpop.f32.mrb[64].mxu1 }
 0x6dd   : > { %2088 = vrot.lane.b32.xlu1 %v2066_v31, %s2956_s16  ;;  %v2655_v35 = vpop.f32.mrb[65].mxu1 }
 0x6de   : > { %v2069_v33 = vpop.f32.mrb[66].mxu1 }
 0x6df   : > { %v2656_v53 = vpop.f32.mrb[67].mxu1 }
 0x70a   : > { %v2081_v34 = vpop.permute.xlu1 %2080 }
 0x70b   : > { %2098 = vst.msk [vmem:[#allocation2 + $0x8] sm:$0xff] %vm2096_vm10, %v2081_v34 }
 0x70e   : > { %v2079_v51 = vpop.permute.xlu0 %2078 }
 0x70f   : > { %2097 = vst.msk [vmem:[#allocation2] sm:$0xff] %vm2096_vm10, %v2079_v51 }
 0x712   : > { %v2104_v37 = vld [vmem:[#allocation2 + $0x8] sm:$0xff] }
 0x713   : > { %v2116_v36 = vmul.f32 0.70710677, %v2104_v37  ;;  %v2110_v46 = vmul.f32 0.5, %v2104_v37 }
 0x715   : > { %2802 = verf.f32 %v2116_v36 }
 0x716   : > { %v2103_v38 = vld [vmem:[#allocation2] sm:$0xff] }
 0x717   : > { %v2115_v39 = vmul.f32 0.70710677, %v2103_v38  ;;  %v2109_v45 = vmul.f32 0.5, %v2103_v38 }
 0x719   : > { %2804 = verf.f32 %v2115_v39 }
 0x71f   : > { %v2803_v41 = vpop.eup %2802 }
 0x720   : > { %v2128_v42 = vadd.f32 1.0, %v2803_v41 }
 0x722   : > { %v2134_v48 = vmul.f32 %v2128_v42, %v2110_v46 }
 0x723   : > { %v2805_v44 = vpop.eup %2804 }
 0x724   : > { %v2127_v47 = vadd.f32 1.0, %v2805_v44 }
 0x726   : > { %v2133_v32 = vmul.f32 %v2127_v47, %v2109_v45 }
 0x728   : > { %v2139_v49 = vpack.c.bf16 %v2134_v48, %v2133_v32 }
 0x72a   : > { %2660 = vmatmul.mubr.msk.bf16.vlgmr.msra.gmra.mrb[52].mxu0 %vm1045_vm6, %v2139_v49 }
 0x72b   : > { %2663 = vmatprep.mubr.msk.bf16.mxu0 %vm2951_vm0, %v2950_v0 }
 0x743   : > { %v2083_v40 = vpop.permute.xlu0 %2082 }
 0x744   : > { %2099 = vst.msk [vmem:[#allocation2 + $0x10] sm:$0xff] %vm2096_vm10, %v2083_v40 }
 0x747   : > { %v2085_v4 = vpop.permute.xlu1 %2084 }
 0x748   : > { %2100 = vst.msk [vmem:[#allocation2 + $0x18] sm:$0xff] %vm2096_vm10, %v2085_v4 }
 0x74b   : > { %v2087_v55 = vpop.permute.xlu0 %2086  ;;  %v2105_v22 = vld [vmem:[#allocation2 + $0x10] sm:$0xff] }
 0x74c   : > { %2101 = vst.msk [vmem:[#allocation2 + $0x20] sm:$0xff] %vm2096_vm10, %v2087_v55  ;;  %v2117_v6 = vmul.f32 0.70710677, %v2105_v22  ;;  %v2111_v2 = vmul.f32 0.5, %v2105_v22 }
 0x74e   : > { %2806 = verf.f32 %v2117_v6 }
 0x74f   : > { %v2089_v56 = vpop.permute.xlu1 %2088  ;;  %v2106_v57 = vld [vmem:[#allocation2 + $0x18] sm:$0xff] }
 0x750   : > { %2102 = vst.msk [vmem:[#allocation2 + $0x28] sm:$0xff] %vm2096_vm10, %v2089_v56  ;;  %v2118_v58 = vmul.f32 0.70710677, %v2106_v57  ;;  %v2112_v8 = vmul.f32 0.5, %v2106_v57 }
 0x752   : > { %2808 = verf.f32 %v2118_v58 }
 0x753   : > { %v2107_v59 = vld [vmem:[#allocation2 + $0x20] sm:$0xff] }
 0x754   : > { %v2119_v60 = vmul.f32 0.70710677, %v2107_v59  ;;  %v2113_v52 = vmul.f32 0.5, %v2107_v59 }
 0x756   : > { %2810 = verf.f32 %v2119_v60 }
 0x757   : > { %v2108_v61 = vld [vmem:[#allocation2 + $0x28] sm:$0xff] }
 0x758   : > { %v2807_v62 = vpop.eup %2806  ;;  %v2120_v28 = vmul.f32 0.70710677, %v2108_v61  ;;  %v2114_v43 = vmul.f32 0.5, %v2108_v61 }
 0x759   : > { %v2129_v63 = vadd.f32 1.0, %v2807_v62 }
 0x75a   : > { %2812 = verf.f32 %v2120_v28 }
 0x75b   : > { %v2135_v50 = vmul.f32 %v2129_v63, %v2111_v2 }
 0x75c   : > { %v2809_v1 = vpop.eup %2808 }
 0x75d   : > { %v2130_v10 = vadd.f32 1.0, %v2809_v1 }
 0x75f   : > { %v2136_v13 = vmul.f32 %v2130_v10, %v2112_v8 }
 0x760   : > { %v2811_v14 = vpop.eup %2810 }
 0x761   : > { %v2140_v15 = vpack.c.bf16 %v2136_v13, %v2135_v50  ;;  %v2131_v54 = vadd.f32 1.0, %v2811_v14 }
 0x763   : > { %2664 = vmatmul.mubr.msk.bf16.gmra.mrb[56].mxu0 %vm1045_vm6, %v2140_v15  ;;  %v2137_v19 = vmul.f32 %v2131_v54, %v2113_v52 }
 0x764   : > { %v2813_v3 = vpop.eup %2812  ;;  %2667 = vmatprep.mubr.msk.bf16.mxu0 %vm2951_vm0, %v2950_v0 }
 0x765   : > { %v2132_v16 = vadd.f32 1.0, %v2813_v3 }
 0x767   : > { %v2138_v20 = vmul.f32 %v2132_v16, %v2114_v43 }
 0x769   : > { %v2141_v7 = vpack.c.bf16 %v2138_v20, %v2137_v19 }
 0x76b   : > { %2668 = vmatmul.mubr.msk.bf16.gmra.mrb[60].mxu0 %vm1045_vm6, %v2141_v7 }
 0x7fd   : > { %v2200_v21 = vpop.f32.mrb[52].mxu0 }
 0x7fe   : > { %v2201_v5 = vadd.f32 %v2403_v11, %v2200_v21  ;;  %v2661_v12 = vpop.f32.mrb[53].mxu0 }
 0x7ff   : > { %v2203_v23 = vpop.f32.mrb[54].mxu0 }
 0x800   : > { %2223 = vst.msk [vmem:[%s405_s23] sm:$0xff] %vm471_vm1, %v2201_v5  ;;  %v2204_v0 = vadd.f32 %v2403_v11, %v2203_v23  ;;  %v2662_v24 = vpop.f32.mrb[55].mxu0 }
 0x802   : > { %2224 = vst.msk [vmem:[%s405_s23 + $0x8] sm:$0xff] %vm471_vm1, %v2204_v0 }
 0x836   : > { %v2208_v9 = vpop.f32.mrb[56].mxu0 }
 0x837   : > { %v2209_v18 = vadd.f32 %v2403_v11, %v2208_v9  ;;  %v2665_v25 = vpop.f32.mrb[57].mxu0 }
 0x838   : > { %v2211_v26 = vpop.f32.mrb[58].mxu0 }
 0x839   : > { %2225 = vst.msk [vmem:[%s405_s23 + $0x10] sm:$0xff] %vm471_vm1, %v2209_v18  ;;  %v2212_v17 = vadd.f32 %v2403_v11, %v2211_v26  ;;  %v2666_v27 = vpop.f32.mrb[59].mxu0 }
 0x83b   : > { %2226 = vst.msk [vmem:[%s405_s23 + $0x18] sm:$0xff] %vm471_vm1, %v2212_v17 }
 0x83e   : > { %v2216_v29 = vpop.f32.mrb[60].mxu0 }
 0x83f   : > { %v2217_v30 = vadd.f32 %v2403_v11, %v2216_v29  ;;  %v2669_v31 = vpop.f32.mrb[61].mxu0 }
 0x840   : > { %v2219_v35 = vpop.f32.mrb[62].mxu0 }
 0x841   : > { %2227 = vst.msk [vmem:[%s405_s23 + $0x20] sm:$0xff] %vm471_vm1, %v2217_v30  ;;  %v2220_v33 = vadd.f32 %v2403_v11, %v2219_v35  ;;  %v2670_v53 = vpop.f32.mrb[63].mxu0 }
 0x843   : > { %2228 = vst.msk [vmem:[%s405_s23 + $0x28] sm:$0xff] %vm471_vm1, %v2220_v33 }
 0x844   : > { %2887 = shalt.err (!%p2884_p3)
}
 0x845   : > { %s2888_s18 = scalar_lea.hbm %s3524_s26, 768  ;;  %s2892_s29 = scalar_lea.hbm %s3579_s9, 1536 }
 0x846   : > { %p2889_p8 = scmp.ne.s32.totalorder %s3524_s26, %s2888_s18  ;;  %p2893_p4 = scmp.lt.u32.totalorder %s3524_s26, %s3579_s9 }
 0x847   : > { %p2894_p6 = scmp.lt.u32.totalorder %s2892_s29, %s2888_s18  ;;  %p2896_p1 = scmp.lt.u32.totalorder %s2888_s18, %s3524_s26 }
 0x848   : > { %p2890_p0 = pnand %p2889_p8, %p3598_p12 }
 0x849   : > { %p2895_p13 = por %p2894_p6, %p2893_p4 }
 0x84a   : > { %p2891_p2 = pneg %p2890_p0 }
 0x84b   : > { %p2897_p10 = por %p2896_p1, %p2895_p13 }
 0x84d   : > { %p2898_p5 = pnand %p2897_p10, %p2891_p2 }
 0x84f   : > { %2901 = shalt.err (!%p2898_p5)
}
 0x850   : > { %s2958_s22 = smov 128  }
 0x851   : > { %2683 = dma.vmem_to_hbm [thread:$0]  (%p3598_p12), %s3518_s28, 768, %s3524_s26, %s2230_s13, %s2958_s22, %s2958_s22, %s2956_s16  }
 0x852 PF: > { %s2258_s17 = sand.u32 1, %s2932_s30   ;;  %p3599_p7 = scmp.ne.s32.totalorder %s3592_s21, 0 }
 0x853   : > { %p3600_p9 = scmp.ge.s32.totalorder %s2944_s12, 2  ;;  %s2259_s11 = scalar_lea.sflag [#allocation5], %s2258_s17 }
 0x855   : > { %p2693_p11 = pnand %p3600_p9, %p3599_p7 }
 0x857   : > { %2927 = dma.done.wait (!%p2693_p11), %s2259_s11, 768  }
 0x858   : > { %2929 = vsyncadd (!%p2693_p11), %s2259_s11, 4294966528  ;;  %s3601_s12 = sld [smem:[#allocation13_spill]]  ;;  %s3602_s20 = sld [smem:[#allocation12_spill]] }
 0x859   : > { %s3603_s11 = sld [smem:[#allocation14_spill]]  ;;  %s3604_s30 = smov %s2936_s10 }
 0x85e   : > { %p25_p3 = scmp.ge.s32.totalorder %s3601_s12, 4   ;;  %s3605_s10 = smov %s3602_s20 }
 0x860   :  { %27 = sbr.rel (!%p25_p3) target bundleno = 9 (0x9), region = 117 }
 0x867   :  { %2264 = vsyncpa [#allocation4], 1 }
 0x868   :  { %2266 = vsyncpa [#allocation4 + $0x1], 1 }
 0x869   :  { %2267 = vsyncpa [#allocation7], 1 }
 0x86a   :  { %2269 = vsyncpa [#allocation7 + $0x1], 1 }
 0x86b   :  { %2270 = vsyncpa [#allocation5], 1 }
 0x86c   :  { %2272 = vsyncpa [#allocation5 + $0x1], 1 }

</bundles_post_ra>
